<compile_context>
chip_gen: v5e
topology: v5e:2x2
jax: 0.10.0
libtpu: 0.0.40
codegen_flags: <defaults>
</compile_context>

<pallas_src>
import functools

import jax
import jax.numpy as jnp
from jax.experimental import pallas as pl
from jax.experimental.pallas import tpu as pltpu

K = 5    # conv kernel size
PAD = 2  # "same" padding for 5x5 stride-1
C_RES = 64
N_RES = 19


# ----------------------------------------------------------------------------
# Small standalone 5x5 conv (conv_in / conv_out / up convs).  In-kernel padding.
# ----------------------------------------------------------------------------
@functools.lru_cache(maxsize=None)
def _make_conv5x5(N, H, W, Cin, Cout, relu):
    Hp, Wp = H + 2 * PAD, W + 2 * PAD

    def kernel(x_ref, w_ref, b_ref, o_ref, xpad):
        # in-kernel "same" padding: zero scratch, copy interior (no HBM pad copy)
        xpad[...] = jnp.zeros((Hp, Wp, Cin), jnp.float32)
        xpad[PAD:PAD + H, PAD:PAD + W, :] = x_ref[0]
        xv = xpad[...]                      # (Hp, Wp, Cin)
        wv = w_ref[...]                     # (5, 5, Cin, Cout)
        acc = None
        for dy in range(K):
            for dx in range(K):
                patch = xv[dy:dy + H, dx:dx + W, :].reshape(H * W, Cin)
                t = jnp.dot(patch, wv[dy, dx],
                            preferred_element_type=jnp.float32)
                acc = t if acc is None else acc + t   # init from first tap
        acc = acc + b_ref[...]
        if relu:
            acc = jnp.maximum(acc, 0.0)
        o_ref[...] = acc.reshape(1, H, W, Cout)

    conv = pl.pallas_call(
        kernel,
        out_shape=jax.ShapeDtypeStruct((N, H, W, Cout), jnp.float32),
        grid=(N,),
        in_specs=[
            pl.BlockSpec((1, H, W, Cin), lambda n: (n, 0, 0, 0)),
            pl.BlockSpec((K, K, Cin, Cout), lambda n: (0, 0, 0, 0)),
            pl.BlockSpec((1, Cout), lambda n: (0, 0)),
        ],
        out_specs=pl.BlockSpec((1, H, W, Cout), lambda n: (n, 0, 0, 0)),
        scratch_shapes=[pltpu.VMEM((Hp, Wp, Cin), jnp.float32)],
        compiler_params=pltpu.CompilerParams(
            dimension_semantics=("parallel",)),
    )
    return jax.jit(conv)


def conv5x5(x, w, b, relu=False):
    """x: (N, H, W, Cin) f32; w: (5,5,Cin,Cout); b: (1,Cout)."""
    N, H, W, Cin = x.shape
    Cout = w.shape[-1]
    fn = _make_conv5x5(N, H, W, Cin, Cout, bool(relu))
    return fn(x, w, b)


# ----------------------------------------------------------------------------
# Fused ResBlock chain: 19 x (conv1 + ReLU, conv2, residual add) in one kernel.
# ----------------------------------------------------------------------------
def _pick_row_chunk(H, W):
    rc = min(H, max(1, 256 // W))   # keep accumulator <= (256, C)
    while H % rc:
        rc -= 1
    return rc


@functools.lru_cache(maxsize=None)
def _make_resblock_chain(N, H, W, C, n_res):
    Hp, Wp = H + 2 * PAD, W + 2 * PAD
    WC = W * C
    LPAD = PAD * C                 # interior lane offset (multiple of 128)
    rc = _pick_row_chunk(H, W)
    n_chunks = H // rc

    def conv_chunk(src_ref, wv, bias, r0, relu):
        # 5x5 conv on output rows [r0, r0+rc): 5 matmuls of depth 5*C (dx-grouped)
        acc = None
        for dy in range(K):
            patch = jnp.concatenate(
                [src_ref[r0 + dy:r0 + dy + rc, dx * C:dx * C + WC]
                 .reshape(rc * W, C) for dx in range(K)],
                axis=1)                                       # (rc*W, 5*C)
            t = jnp.dot(patch, wv[dy], preferred_element_type=jnp.float32)
            acc = t if acc is None else acc + t               # init from first tap
        acc = acc + bias
        if relu:
            acc = jnp.maximum(acc, 0.0)
        return acc.reshape(rc, WC)

    def kernel(x_ref, w1_ref, b1_ref, w2_ref, b2_ref, o_ref, xpad, hpad):
        r = pl.program_id(1)

        @pl.when(r == 0)
        def _init():
            # zero-padded activation buffers; interiors are the only parts
            # ever rewritten, so the zero borders persist across resblocks.
            xpad[...] = jnp.zeros((Hp, Wp * C), jnp.float32)
            hpad[...] = jnp.zeros((Hp, Wp * C), jnp.float32)
            xpad[PAD:PAD + H, LPAD:LPAD + WC] = x_ref[0]

        w1 = w1_ref[0]            # (5, 5*C, C)
        w2 = w2_ref[0]
        b1 = b1_ref[0]            # (1, C)
        b2 = b2_ref[0]

        # conv1 + ReLU -> hpad interior
        for ci in range(n_chunks):
            r0 = ci * rc
            h = conv_chunk(xpad, w1, b1, r0, relu=True)
            hpad[PAD + r0:PAD + r0 + rc, LPAD:LPAD + WC] = h

        # conv2 + residual add -> xpad interior becomes the new activation
        for ci in range(n_chunks):
            r0 = ci * rc
            y = conv_chunk(hpad, w2, b2, r0, relu=False)
            xpad[PAD + r0:PAD + r0 + rc, LPAD:LPAD + WC] = (
                xpad[PAD + r0:PAD + r0 + rc, LPAD:LPAD + WC] + y)

        @pl.when(r == n_res - 1)
        def _finish():
            o_ref[0] = xpad[PAD:PAD + H, LPAD:LPAD + WC]

    chain = pl.pallas_call(
        kernel,
        out_shape=jax.ShapeDtypeStruct((N, H, WC), jnp.float32),
        grid=(N, n_res),
        in_specs=[
            pl.BlockSpec((1, H, WC), lambda n, r: (n, 0, 0)),           # activation (resident)
            pl.BlockSpec((1, K, K * C, C), lambda n, r: (r, 0, 0, 0)),  # w1[r] streamed
            pl.BlockSpec((1, 1, C), lambda n, r: (r, 0, 0)),            # b1[r]
            pl.BlockSpec((1, K, K * C, C), lambda n, r: (r, 0, 0, 0)),  # w2[r] streamed
            pl.BlockSpec((1, 1, C), lambda n, r: (r, 0, 0)),            # b2[r]
        ],
        out_specs=pl.BlockSpec((1, H, WC), lambda n, r: (n, 0, 0)),
        scratch_shapes=[
            pltpu.VMEM((Hp, Wp * C), jnp.float32),   # padded activation
            pltpu.VMEM((Hp, Wp * C), jnp.float32),   # padded intermediate
        ],
        compiler_params=pltpu.CompilerParams(
            dimension_semantics=("parallel", "arbitrary")),
    )
    return jax.jit(chain)


def resblock_chain(x, w1, b1, w2, b2):
    """x: (N, H, W, 64); w*: (n_res, 5, 5*64, 64); b*: (n_res, 1, 64)."""
    N, H, W, C = x.shape
    n_res = int(w1.shape[0])
    fn = _make_resblock_chain(N, H, W, C, n_res)
    out = fn(x.reshape(N, H, W * C), w1, b1, w2, b2)
    return out.reshape(N, H, W, C)


# ----------------------------------------------------------------------------
# Glue ops (plain JAX): pixel shuffle, concat.
# ----------------------------------------------------------------------------
def pixel_shuffle_nhwc(x, r=2):
    # matches torch.nn.PixelShuffle channel ordering: C = c * r * r + i * r + j
    N, H, W, C = x.shape
    c = C // (r * r)
    x = x.reshape(N, H, W, c, r, r)
    x = x.transpose(0, 1, 4, 2, 5, 3)          # (N, H, r, W, r, c)
    return x.reshape(N, H * r, W * r, c)


# ----------------------------------------------------------------------------
# Deterministic parameter init (PyTorch-conv-default-like uniform bounds).
# ----------------------------------------------------------------------------
def conv_init(key, cin, cout):
    kw, kb = jax.random.split(key)
    bound = 1.0 / float((cin * K * K) ** 0.5)
    w = jax.random.uniform(kw, (K, K, cin, cout), jnp.float32, -bound, bound)
    b = jax.random.uniform(kb, (1, cout), jnp.float32, -bound, bound)
    return w, b


def init_tunnel(key, in_channel, n_res=N_RES):
    keys = jax.random.split(key, 2 + 2 * n_res)
    conv_in = conv_init(keys[0], in_channel, C_RES)
    w1s, b1s, w2s, b2s = [], [], [], []
    for i in range(n_res):
        w1, b1 = conv_init(keys[1 + 2 * i], C_RES, C_RES)
        w2, b2 = conv_init(keys[2 + 2 * i], C_RES, C_RES)
        # group dx into the contraction axis: (5,5,C,C) -> (5, 5*C, C)
        w1s.append(w1.reshape(K, K * C_RES, C_RES))
        w2s.append(w2.reshape(K, K * C_RES, C_RES))
        b1s.append(b1)
        b2s.append(b2)
    conv_out = conv_init(keys[-1], C_RES, 3)
    return dict(conv_in=conv_in,
                res_w1=jnp.stack(w1s), res_b1=jnp.stack(b1s),
                res_w2=jnp.stack(w2s), res_b2=jnp.stack(b2s),
                conv_out=conv_out)


def init_pyramid(key):
    k1, k2, k3, ku2, ku3 = jax.random.split(key, 5)
    return dict(
        tunnel1=init_tunnel(k1, 3),
        tunnel2=init_tunnel(k2, 6),
        tunnel3=init_tunnel(k3, 6),
        up2=conv_init(ku2, 3, 3 * 4),
        up3=conv_init(ku3, 3, 3 * 4),
    )


# ----------------------------------------------------------------------------
# Forward passes.
# ----------------------------------------------------------------------------
def tunnel_apply(p, x):
    w, b = p["conv_in"]
    x = conv5x5(x, w, b)
    x = resblock_chain(x, p["res_w1"], p["res_b1"], p["res_w2"], p["res_b2"])
    w, b = p["conv_out"]
    return conv5x5(x, w, b)


def _pyramid_forward(params, bimg0, bimg1, bimg2):
    results = []
    x = tunnel_apply(params["tunnel1"], bimg0)
    results.append(x)

    u = pixel_shuffle_nhwc(conv5x5(x, *params["up2"]), 2)
    x = tunnel_apply(params["tunnel2"], jnp.concatenate([bimg1, u], axis=-1))
    results.append(x)

    u = pixel_shuffle_nhwc(conv5x5(x, *params["up3"]), 2)
    x = tunnel_apply(params["tunnel3"], jnp.concatenate([bimg2, u], axis=-1))
    results.append(x)
    return results


pyramid_forward = jax.jit(_pyramid_forward)


# ----------------------------------------------------------------------------
if __name__ == "__main__":
    key = jax.random.PRNGKey(0)
    k_params, k0, k1, k2 = jax.random.split(key, 4)

    params = init_pyramid(k_params)

    N = 2
    # pyramid inputs: each level is 2x the spatial size of the previous one
    bimg0 = jax.random.normal(k0, (N, 8, 8, 3), jnp.float32)
    bimg1 = jax.random.normal(k1, (N, 16, 16, 3), jnp.float32)
    bimg2 = jax.random.normal(k2, (N, 32, 32, 3), jnp.float32)

    results = pyramid_forward(params, bimg0, bimg1, bimg2)
    for r in results:
        jax.block_until_ready(r)

    expected_shapes = [(N, 8, 8, 3), (N, 16, 16, 3), (N, 32, 32, 3)]
    assert [tuple(r.shape) for r in results] == expected_shapes
    assert all(bool(jnp.all(jnp.isfinite(r))) for r in results)
    print("KERNEL_OK")
</pallas_src>

<mosaic_0001>
module attributes {stable_mosaic.version = 11 : i64} {
  func.func @kernel(%arg0: i32, %arg1: memref<1x8x8x3xf32, #tpu.memory_space<vmem>>, %arg2: memref<5x5x3x64xf32, #tpu.memory_space<vmem>>, %arg3: memref<1x64xf32, #tpu.memory_space<vmem>>, %arg4: memref<1x8x8x64xf32, #tpu.memory_space<vmem>>, %arg5: memref<12x12x3xf32, #tpu.memory_space<vmem>>) attributes {dimension_semantics = [#tpu.dimension_semantics<parallel>], iteration_bounds = array<i64: 2>, scalar_prefetch = 0 : i64, scratch_operands = 1 : i64, tpu.core_type = #tpu.core_type<tc>, window_params = [{transform_indices = @transform_0, window_bounds = array<i64: 1, 8, 8, 3>}, {pipeline_mode = #tpu.pipeline_mode<synchronous>, transform_indices = @transform_1, window_bounds = array<i64: 5, 5, 3, 64>}, {pipeline_mode = #tpu.pipeline_mode<synchronous>, transform_indices = @transform_2, window_bounds = array<i64: 1, 64>}, {transform_indices = @transform_3, window_bounds = array<i64: 1, 8, 8, 64>}]} {
    %cst = arith.constant 0.000000e+00 : f32
    %0 = vector.broadcast %cst : f32 to vector<12x12x3xf32>
    %c0 = arith.constant 0 : index
    %c0_0 = arith.constant 0 : index
    %c0_1 = arith.constant 0 : index
    %1 = vector.load %arg5[%c0, %c0_0, %c0_1] : memref<12x12x3xf32, #tpu.memory_space<vmem>>, vector<12x12x3xf32>
    tpu.vector_store %arg5[%c0, %c0_0, %c0_1], %0 {strides = array<i32>} : memref<12x12x3xf32, #tpu.memory_space<vmem>>, vector<12x12x3xf32>,
    %c0_2 = arith.constant 0 : index
    %c0_3 = arith.constant 0 : index
    %c0_4 = arith.constant 0 : index
    %c0_5 = arith.constant 0 : index
    %2 = vector.load %arg1[%c0_2, %c0_3, %c0_4, %c0_5] : memref<1x8x8x3xf32, #tpu.memory_space<vmem>>, vector<1x8x8x3xf32>
    %3 = vector.shape_cast %2 : vector<1x8x8x3xf32> to vector<8x8x3xf32>
    %c2 = arith.constant 2 : index
    %c2_6 = arith.constant 2 : index
    %c0_7 = arith.constant 0 : index
    %4 = vector.load %arg5[%c2, %c2_6, %c0_7] : memref<12x12x3xf32, #tpu.memory_space<vmem>>, vector<8x8x3xf32>
    tpu.vector_store %arg5[%c2, %c2_6, %c0_7], %3 {strides = array<i32>} : memref<12x12x3xf32, #tpu.memory_space<vmem>>, vector<8x8x3xf32>,
    %c0_8 = arith.constant 0 : index
    %c0_9 = arith.constant 0 : index
    %c0_10 = arith.constant 0 : index
    %5 = vector.load %arg5[%c0_8, %c0_9, %c0_10] : memref<12x12x3xf32, #tpu.memory_space<vmem>>, vector<12x12x3xf32>
    %c0_11 = arith.constant 0 : index
    %c0_12 = arith.constant 0 : index
    %c0_13 = arith.constant 0 : index
    %c0_14 = arith.constant 0 : index
    %6 = vector.load %arg2[%c0_11, %c0_12, %c0_13, %c0_14] : memref<5x5x3x64xf32, #tpu.memory_space<vmem>>, vector<5x5x3x64xf32>
    %7 = vector.extract_strided_slice %5 {offsets = [0, 0, 0], sizes = [8, 8, 3], strides = [1, 1, 1]} : vector<12x12x3xf32> to vector<8x8x3xf32>
    %8 = vector.shape_cast %7 : vector<8x8x3xf32> to vector<64x3xf32>
    %9 = vector.extract_strided_slice %6 {offsets = [0, 0, 0, 0], sizes = [1, 1, 3, 64], strides = [1, 1, 1, 1]} : vector<5x5x3x64xf32> to vector<1x1x3x64xf32>
    %10 = vector.shape_cast %9 : vector<1x1x3x64xf32> to vector<3x64xf32>
    %cst_15 = arith.constant dense<0.000000e+00> : vector<64x64xf32>
    %11 = tpu.matmul %8, %10, %cst_15 {dimension_numbers = #tpu.dot_dimension_numbers<[1], [0], [0], [1], [0, 0, 1, 1], [], []>} : vector<64x3xf32>, vector<3x64xf32>, vector<64x64xf32> -> vector<64x64xf32>
    %12 = vector.extract_strided_slice %5 {offsets = [0, 1, 0], sizes = [8, 8, 3], strides = [1, 1, 1]} : vector<12x12x3xf32> to vector<8x8x3xf32>
    %13 = vector.shape_cast %12 : vector<8x8x3xf32> to vector<64x3xf32>
    %14 = vector.extract_strided_slice %6 {offsets = [0, 1, 0, 0], sizes = [1, 1, 3, 64], strides = [1, 1, 1, 1]} : vector<5x5x3x64xf32> to vector<1x1x3x64xf32>
    %15 = vector.shape_cast %14 : vector<1x1x3x64xf32> to vector<3x64xf32>
    %cst_16 = arith.constant dense<0.000000e+00> : vector<64x64xf32>
    %16 = tpu.matmul %13, %15, %cst_16 {dimension_numbers = #tpu.dot_dimension_numbers<[1], [0], [0], [1], [0, 0, 1, 1], [], []>} : vector<64x3xf32>, vector<3x64xf32>, vector<64x64xf32> -> vector<64x64xf32>
    %17 = arith.addf %11, %16 : vector<64x64xf32>
    %18 = vector.extract_strided_slice %5 {offsets = [0, 2, 0], sizes = [8, 8, 3], strides = [1, 1, 1]} : vector<12x12x3xf32> to vector<8x8x3xf32>
    %19 = vector.shape_cast %18 : vector<8x8x3xf32> to vector<64x3xf32>
    %20 = vector.extract_strided_slice %6 {offsets = [0, 2, 0, 0], sizes = [1, 1, 3, 64], strides = [1, 1, 1, 1]} : vector<5x5x3x64xf32> to vector<1x1x3x64xf32>
    %21 = vector.shape_cast %20 : vector<1x1x3x64xf32> to vector<3x64xf32>
    %cst_17 = arith.constant dense<0.000000e+00> : vector<64x64xf32>
    %22 = tpu.matmul %19, %21, %cst_17 {dimension_numbers = #tpu.dot_dimension_numbers<[1], [0], [0], [1], [0, 0, 1, 1], [], []>} : vector<64x3xf32>, vector<3x64xf32>, vector<64x64xf32> -> vector<64x64xf32>
    %23 = arith.addf %17, %22 : vector<64x64xf32>
    %24 = vector.extract_strided_slice %5 {offsets = [0, 3, 0], sizes = [8, 8, 3], strides = [1, 1, 1]} : vector<12x12x3xf32> to vector<8x8x3xf32>
    %25 = vector.shape_cast %24 : vector<8x8x3xf32> to vector<64x3xf32>
    %26 = vector.extract_strided_slice %6 {offsets = [0, 3, 0, 0], sizes = [1, 1, 3, 64], strides = [1, 1, 1, 1]} : vector<5x5x3x64xf32> to vector<1x1x3x64xf32>
    %27 = vector.shape_cast %26 : vector<1x1x3x64xf32> to vector<3x64xf32>
    %cst_18 = arith.constant dense<0.000000e+00> : vector<64x64xf32>
    %28 = tpu.matmul %25, %27, %cst_18 {dimension_numbers = #tpu.dot_dimension_numbers<[1], [0], [0], [1], [0, 0, 1, 1], [], []>} : vector<64x3xf32>, vector<3x64xf32>, vector<64x64xf32> -> vector<64x64xf32>
    %29 = arith.addf %23, %28 : vector<64x64xf32>
    %30 = vector.extract_strided_slice %5 {offsets = [0, 4, 0], sizes = [8, 8, 3], strides = [1, 1, 1]} : vector<12x12x3xf32> to vector<8x8x3xf32>
    %31 = vector.shape_cast %30 : vector<8x8x3xf32> to vector<64x3xf32>
    %32 = vector.extract_strided_slice %6 {offsets = [0, 4, 0, 0], sizes = [1, 1, 3, 64], strides = [1, 1, 1, 1]} : vector<5x5x3x64xf32> to vector<1x1x3x64xf32>
    %33 = vector.shape_cast %32 : vector<1x1x3x64xf32> to vector<3x64xf32>
    %cst_19 = arith.constant dense<0.000000e+00> : vector<64x64xf32>
    %34 = tpu.matmul %31, %33, %cst_19 {dimension_numbers = #tpu.dot_dimension_numbers<[1], [0], [0], [1], [0, 0, 1, 1], [], []>} : vector<64x3xf32>, vector<3x64xf32>, vector<64x64xf32> -> vector<64x64xf32>
    %35 = arith.addf %29, %34 : vector<64x64xf32>
    %36 = vector.extract_strided_slice %5 {offsets = [1, 0, 0], sizes = [8, 8, 3], strides = [1, 1, 1]} : vector<12x12x3xf32> to vector<8x8x3xf32>
    %37 = vector.shape_cast %36 : vector<8x8x3xf32> to vector<64x3xf32>
    %38 = vector.extract_strided_slice %6 {offsets = [1, 0, 0, 0], sizes = [1, 1, 3, 64], strides = [1, 1, 1, 1]} : vector<5x5x3x64xf32> to vector<1x1x3x64xf32>
    %39 = vector.shape_cast %38 : vector<1x1x3x64xf32> to vector<3x64xf32>
    %cst_20 = arith.constant dense<0.000000e+00> : vector<64x64xf32>
    %40 = tpu.matmul %37, %39, %cst_20 {dimension_numbers = #tpu.dot_dimension_numbers<[1], [0], [0], [1], [0, 0, 1, 1], [], []>} : vector<64x3xf32>, vector<3x64xf32>, vector<64x64xf32> -> vector<64x64xf32>
    %41 = arith.addf %35, %40 : vector<64x64xf32>
    %42 = vector.extract_strided_slice %5 {offsets = [1, 1, 0], sizes = [8, 8, 3], strides = [1, 1, 1]} : vector<12x12x3xf32> to vector<8x8x3xf32>
    %43 = vector.shape_cast %42 : vector<8x8x3xf32> to vector<64x3xf32>
    %44 = vector.extract_strided_slice %6 {offsets = [1, 1, 0, 0], sizes = [1, 1, 3, 64], strides = [1, 1, 1, 1]} : vector<5x5x3x64xf32> to vector<1x1x3x64xf32>
    %45 = vector.shape_cast %44 : vector<1x1x3x64xf32> to vector<3x64xf32>
    %cst_21 = arith.constant dense<0.000000e+00> : vector<64x64xf32>
    %46 = tpu.matmul %43, %45, %cst_21 {dimension_numbers = #tpu.dot_dimension_numbers<[1], [0], [0], [1], [0, 0, 1, 1], [], []>} : vector<64x3xf32>, vector<3x64xf32>, vector<64x64xf32> -> vector<64x64xf32>
    %47 = arith.addf %41, %46 : vector<64x64xf32>
    %48 = vector.extract_strided_slice %5 {offsets = [1, 2, 0], sizes = [8, 8, 3], strides = [1, 1, 1]} : vector<12x12x3xf32> to vector<8x8x3xf32>
    %49 = vector.shape_cast %48 : vector<8x8x3xf32> to vector<64x3xf32>
    %50 = vector.extract_strided_slice %6 {offsets = [1, 2, 0, 0], sizes = [1, 1, 3, 64], strides = [1, 1, 1, 1]} : vector<5x5x3x64xf32> to vector<1x1x3x64xf32>
    %51 = vector.shape_cast %50 : vector<1x1x3x64xf32> to vector<3x64xf32>
    %cst_22 = arith.constant dense<0.000000e+00> : vector<64x64xf32>
    %52 = tpu.matmul %49, %51, %cst_22 {dimension_numbers = #tpu.dot_dimension_numbers<[1], [0], [0], [1], [0, 0, 1, 1], [], []>} : vector<64x3xf32>, vector<3x64xf32>, vector<64x64xf32> -> vector<64x64xf32>
    %53 = arith.addf %47, %52 : vector<64x64xf32>
    %54 = vector.extract_strided_slice %5 {offsets = [1, 3, 0], sizes = [8, 8, 3], strides = [1, 1, 1]} : vector<12x12x3xf32> to vector<8x8x3xf32>
    %55 = vector.shape_cast %54 : vector<8x8x3xf32> to vector<64x3xf32>
    %56 = vector.extract_strided_slice %6 {offsets = [1, 3, 0, 0], sizes = [1, 1, 3, 64], strides = [1, 1, 1, 1]} : vector<5x5x3x64xf32> to vector<1x1x3x64xf32>
    %57 = vector.shape_cast %56 : vector<1x1x3x64xf32> to vector<3x64xf32>
    %cst_23 = arith.constant dense<0.000000e+00> : vector<64x64xf32>
    %58 = tpu.matmul %55, %57, %cst_23 {dimension_numbers = #tpu.dot_dimension_numbers<[1], [0], [0], [1], [0, 0, 1, 1], [], []>} : vector<64x3xf32>, vector<3x64xf32>, vector<64x64xf32> -> vector<64x64xf32>
    %59 = arith.addf %53, %58 : vector<64x64xf32>
    %60 = vector.extract_strided_slice %5 {offsets = [1, 4, 0], sizes = [8, 8, 3], strides = [1, 1, 1]} : vector<12x12x3xf32> to vector<8x8x3xf32>
    %61 = vector.shape_cast %60 : vector<8x8x3xf32> to vector<64x3xf32>
    %62 = vector.extract_strided_slice %6 {offsets = [1, 4, 0, 0], sizes = [1, 1, 3, 64], strides = [1, 1, 1, 1]} : vector<5x5x3x64xf32> to vector<1x1x3x64xf32>
    %63 = vector.shape_cast %62 : vector<1x1x3x64xf32> to vector<3x64xf32>
    %cst_24 = arith.constant dense<0.000000e+00> : vector<64x64xf32>
    %64 = tpu.matmul %61, %63, %cst_24 {dimension_numbers = #tpu.dot_dimension_numbers<[1], [0], [0], [1], [0, 0, 1, 1], [], []>} : vector<64x3xf32>, vector<3x64xf32>, vector<64x64xf32> -> vector<64x64xf32>
    %65 = arith.addf %59, %64 : vector<64x64xf32>
    %66 = vector.extract_strided_slice %5 {offsets = [2, 0, 0], sizes = [8, 8, 3], strides = [1, 1, 1]} : vector<12x12x3xf32> to vector<8x8x3xf32>
    %67 = vector.shape_cast %66 : vector<8x8x3xf32> to vector<64x3xf32>
    %68 = vector.extract_strided_slice %6 {offsets = [2, 0, 0, 0], sizes = [1, 1, 3, 64], strides = [1, 1, 1, 1]} : vector<5x5x3x64xf32> to vector<1x1x3x64xf32>
    %69 = vector.shape_cast %68 : vector<1x1x3x64xf32> to vector<3x64xf32>
    %cst_25 = arith.constant dense<0.000000e+00> : vector<64x64xf32>
    %70 = tpu.matmul %67, %69, %cst_25 {dimension_numbers = #tpu.dot_dimension_numbers<[1], [0], [0], [1], [0, 0, 1, 1], [], []>} : vector<64x3xf32>, vector<3x64xf32>, vector<64x64xf32> -> vector<64x64xf32>
    %71 = arith.addf %65, %70 : vector<64x64xf32>
    %72 = vector.extract_strided_slice %5 {offsets = [2, 1, 0], sizes = [8, 8, 3], strides = [1, 1, 1]} : vector<12x12x3xf32> to vector<8x8x3xf32>
    %73 = vector.shape_cast %72 : vector<8x8x3xf32> to vector<64x3xf32>
    %74 = vector.extract_strided_slice %6 {offsets = [2, 1, 0, 0], sizes = [1, 1, 3, 64], strides = [1, 1, 1, 1]} : vector<5x5x3x64xf32> to vector<1x1x3x64xf32>
    %75 = vector.shape_cast %74 : vector<1x1x3x64xf32> to vector<3x64xf32>
    %cst_26 = arith.constant dense<0.000000e+00> : vector<64x64xf32>
    %76 = tpu.matmul %73, %75, %cst_26 {dimension_numbers = #tpu.dot_dimension_numbers<[1], [0], [0], [1], [0, 0, 1, 1], [], []>} : vector<64x3xf32>, vector<3x64xf32>, vector<64x64xf32> -> vector<64x64xf32>
    %77 = arith.addf %71, %76 : vector<64x64xf32>
    %78 = vector.extract_strided_slice %5 {offsets = [2, 2, 0], sizes = [8, 8, 3], strides = [1, 1, 1]} : vector<12x12x3xf32> to vector<8x8x3xf32>
    %79 = vector.shape_cast %78 : vector<8x8x3xf32> to vector<64x3xf32>
    %80 = vector.extract_strided_slice %6 {offsets = [2, 2, 0, 0], sizes = [1, 1, 3, 64], strides = [1, 1, 1, 1]} : vector<5x5x3x64xf32> to vector<1x1x3x64xf32>
    %81 = vector.shape_cast %80 : vector<1x1x3x64xf32> to vector<3x64xf32>
    %cst_27 = arith.constant dense<0.000000e+00> : vector<64x64xf32>
    %82 = tpu.matmul %79, %81, %cst_27 {dimension_numbers = #tpu.dot_dimension_numbers<[1], [0], [0], [1], [0, 0, 1, 1], [], []>} : vector<64x3xf32>, vector<3x64xf32>, vector<64x64xf32> -> vector<64x64xf32>
    %83 = arith.addf %77, %82 : vector<64x64xf32>
    %84 = vector.extract_strided_slice %5 {offsets = [2, 3, 0], sizes = [8, 8, 3], strides = [1, 1, 1]} : vector<12x12x3xf32> to vector<8x8x3xf32>
    %85 = vector.shape_cast %84 : vector<8x8x3xf32> to vector<64x3xf32>
    %86 = vector.extract_strided_slice %6 {offsets = [2, 3, 0, 0], sizes = [1, 1, 3, 64], strides = [1, 1, 1, 1]} : vector<5x5x3x64xf32> to vector<1x1x3x64xf32>
    %87 = vector.shape_cast %86 : vector<1x1x3x64xf32> to vector<3x64xf32>
    %cst_28 = arith.constant dense<0.000000e+00> : vector<64x64xf32>
    %88 = tpu.matmul %85, %87, %cst_28 {dimension_numbers = #tpu.dot_dimension_numbers<[1], [0], [0], [1], [0, 0, 1, 1], [], []>} : vector<64x3xf32>, vector<3x64xf32>, vector<64x64xf32> -> vector<64x64xf32>
    %89 = arith.addf %83, %88 : vector<64x64xf32>
    %90 = vector.extract_strided_slice %5 {offsets = [2, 4, 0], sizes = [8, 8, 3], strides = [1, 1, 1]} : vector<12x12x3xf32> to vector<8x8x3xf32>
    %91 = vector.shape_cast %90 : vector<8x8x3xf32> to vector<64x3xf32>
    %92 = vector.extract_strided_slice %6 {offsets = [2, 4, 0, 0], sizes = [1, 1, 3, 64], strides = [1, 1, 1, 1]} : vector<5x5x3x64xf32> to vector<1x1x3x64xf32>
    %93 = vector.shape_cast %92 : vector<1x1x3x64xf32> to vector<3x64xf32>
    %cst_29 = arith.constant dense<0.000000e+00> : vector<64x64xf32>
    %94 = tpu.matmul %91, %93, %cst_29 {dimension_numbers = #tpu.dot_dimension_numbers<[1], [0], [0], [1], [0, 0, 1, 1], [], []>} : vector<64x3xf32>, vector<3x64xf32>, vector<64x64xf32> -> vector<64x64xf32>
    %95 = arith.addf %89, %94 : vector<64x64xf32>
    %96 = vector.extract_strided_slice %5 {offsets = [3, 0, 0], sizes = [8, 8, 3], strides = [1, 1, 1]} : vector<12x12x3xf32> to vector<8x8x3xf32>
    %97 = vector.shape_cast %96 : vector<8x8x3xf32> to vector<64x3xf32>
    %98 = vector.extract_strided_slice %6 {offsets = [3, 0, 0, 0], sizes = [1, 1, 3, 64], strides = [1, 1, 1, 1]} : vector<5x5x3x64xf32> to vector<1x1x3x64xf32>
    %99 = vector.shape_cast %98 : vector<1x1x3x64xf32> to vector<3x64xf32>
    %cst_30 = arith.constant dense<0.000000e+00> : vector<64x64xf32>
    %100 = tpu.matmul %97, %99, %cst_30 {dimension_numbers = #tpu.dot_dimension_numbers<[1], [0], [0], [1], [0, 0, 1, 1], [], []>} : vector<64x3xf32>, vector<3x64xf32>, vector<64x64xf32> -> vector<64x64xf32>
    %101 = arith.addf %95, %100 : vector<64x64xf32>
    %102 = vector.extract_strided_slice %5 {offsets = [3, 1, 0], sizes = [8, 8, 3], strides = [1, 1, 1]} : vector<12x12x3xf32> to vector<8x8x3xf32>
    %103 = vector.shape_cast %102 : vector<8x8x3xf32> to vector<64x3xf32>
    %104 = vector.extract_strided_slice %6 {offsets = [3, 1, 0, 0], sizes = [1, 1, 3, 64], strides = [1, 1, 1, 1]} : vector<5x5x3x64xf32> to vector<1x1x3x64xf32>
    %105 = vector.shape_cast %104 : vector<1x1x3x64xf32> to vector<3x64xf32>
    %cst_31 = arith.constant dense<0.000000e+00> : vector<64x64xf32>
    %106 = tpu.matmul %103, %105, %cst_31 {dimension_numbers = #tpu.dot_dimension_numbers<[1], [0], [0], [1], [0, 0, 1, 1], [], []>} : vector<64x3xf32>, vector<3x64xf32>, vector<64x64xf32> -> vector<64x64xf32>
    %107 = arith.addf %101, %106 : vector<64x64xf32>
    %108 = vector.extract_strided_slice %5 {offsets = [3, 2, 0], sizes = [8, 8, 3], strides = [1, 1, 1]} : vector<12x12x3xf32> to vector<8x8x3xf32>
    %109 = vector.shape_cast %108 : vector<8x8x3xf32> to vector<64x3xf32>
    %110 = vector.extract_strided_slice %6 {offsets = [3, 2, 0, 0], sizes = [1, 1, 3, 64], strides = [1, 1, 1, 1]} : vector<5x5x3x64xf32> to vector<1x1x3x64xf32>
    %111 = vector.shape_cast %110 : vector<1x1x3x64xf32> to vector<3x64xf32>
    %cst_32 = arith.constant dense<0.000000e+00> : vector<64x64xf32>
    %112 = tpu.matmul %109, %111, %cst_32 {dimension_numbers = #tpu.dot_dimension_numbers<[1], [0], [0], [1], [0, 0, 1, 1], [], []>} : vector<64x3xf32>, vector<3x64xf32>, vector<64x64xf32> -> vector<64x64xf32>
    %113 = arith.addf %107, %112 : vector<64x64xf32>
    %114 = vector.extract_strided_slice %5 {offsets = [3, 3, 0], sizes = [8, 8, 3], strides = [1, 1, 1]} : vector<12x12x3xf32> to vector<8x8x3xf32>
    %115 = vector.shape_cast %114 : vector<8x8x3xf32> to vector<64x3xf32>
    %116 = vector.extract_strided_slice %6 {offsets = [3, 3, 0, 0], sizes = [1, 1, 3, 64], strides = [1, 1, 1, 1]} : vector<5x5x3x64xf32> to vector<1x1x3x64xf32>
    %117 = vector.shape_cast %116 : vector<1x1x3x64xf32> to vector<3x64xf32>
    %cst_33 = arith.constant dense<0.000000e+00> : vector<64x64xf32>
    %118 = tpu.matmul %115, %117, %cst_33 {dimension_numbers = #tpu.dot_dimension_numbers<[1], [0], [0], [1], [0, 0, 1, 1], [], []>} : vector<64x3xf32>, vector<3x64xf32>, vector<64x64xf32> -> vector<64x64xf32>
    %119 = arith.addf %113, %118 : vector<64x64xf32>
    %120 = vector.extract_strided_slice %5 {offsets = [3, 4, 0], sizes = [8, 8, 3], strides = [1, 1, 1]} : vector<12x12x3xf32> to vector<8x8x3xf32>
    %121 = vector.shape_cast %120 : vector<8x8x3xf32> to vector<64x3xf32>
    %122 = vector.extract_strided_slice %6 {offsets = [3, 4, 0, 0], sizes = [1, 1, 3, 64], strides = [1, 1, 1, 1]} : vector<5x5x3x64xf32> to vector<1x1x3x64xf32>
    %123 = vector.shape_cast %122 : vector<1x1x3x64xf32> to vector<3x64xf32>
    %cst_34 = arith.constant dense<0.000000e+00> : vector<64x64xf32>
    %124 = tpu.matmul %121, %123, %cst_34 {dimension_numbers = #tpu.dot_dimension_numbers<[1], [0], [0], [1], [0, 0, 1, 1], [], []>} : vector<64x3xf32>, vector<3x64xf32>, vector<64x64xf32> -> vector<64x64xf32>
    %125 = arith.addf %119, %124 : vector<64x64xf32>
    %126 = vector.extract_strided_slice %5 {offsets = [4, 0, 0], sizes = [8, 8, 3], strides = [1, 1, 1]} : vector<12x12x3xf32> to vector<8x8x3xf32>
    %127 = vector.shape_cast %126 : vector<8x8x3xf32> to vector<64x3xf32>
    %128 = vector.extract_strided_slice %6 {offsets = [4, 0, 0, 0], sizes = [1, 1, 3, 64], strides = [1, 1, 1, 1]} : vector<5x5x3x64xf32> to vector<1x1x3x64xf32>
    %129 = vector.shape_cast %128 : vector<1x1x3x64xf32> to vector<3x64xf32>
    %cst_35 = arith.constant dense<0.000000e+00> : vector<64x64xf32>
    %130 = tpu.matmul %127, %129, %cst_35 {dimension_numbers = #tpu.dot_dimension_numbers<[1], [0], [0], [1], [0, 0, 1, 1], [], []>} : vector<64x3xf32>, vector<3x64xf32>, vector<64x64xf32> -> vector<64x64xf32>
    %131 = arith.addf %125, %130 : vector<64x64xf32>
    %132 = vector.extract_strided_slice %5 {offsets = [4, 1, 0], sizes = [8, 8, 3], strides = [1, 1, 1]} : vector<12x12x3xf32> to vector<8x8x3xf32>
    %133 = vector.shape_cast %132 : vector<8x8x3xf32> to vector<64x3xf32>
    %134 = vector.extract_strided_slice %6 {offsets = [4, 1, 0, 0], sizes = [1, 1, 3, 64], strides = [1, 1, 1, 1]} : vector<5x5x3x64xf32> to vector<1x1x3x64xf32>
    %135 = vector.shape_cast %134 : vector<1x1x3x64xf32> to vector<3x64xf32>
    %cst_36 = arith.constant dense<0.000000e+00> : vector<64x64xf32>
    %136 = tpu.matmul %133, %135, %cst_36 {dimension_numbers = #tpu.dot_dimension_numbers<[1], [0], [0], [1], [0, 0, 1, 1], [], []>} : vector<64x3xf32>, vector<3x64xf32>, vector<64x64xf32> -> vector<64x64xf32>
    %137 = arith.addf %131, %136 : vector<64x64xf32>
    %138 = vector.extract_strided_slice %5 {offsets = [4, 2, 0], sizes = [8, 8, 3], strides = [1, 1, 1]} : vector<12x12x3xf32> to vector<8x8x3xf32>
    %139 = vector.shape_cast %138 : vector<8x8x3xf32> to vector<64x3xf32>
    %140 = vector.extract_strided_slice %6 {offsets = [4, 2, 0, 0], sizes = [1, 1, 3, 64], strides = [1, 1, 1, 1]} : vector<5x5x3x64xf32> to vector<1x1x3x64xf32>
    %141 = vector.shape_cast %140 : vector<1x1x3x64xf32> to vector<3x64xf32>
    %cst_37 = arith.constant dense<0.000000e+00> : vector<64x64xf32>
    %142 = tpu.matmul %139, %141, %cst_37 {dimension_numbers = #tpu.dot_dimension_numbers<[1], [0], [0], [1], [0, 0, 1, 1], [], []>} : vector<64x3xf32>, vector<3x64xf32>, vector<64x64xf32> -> vector<64x64xf32>
    %143 = arith.addf %137, %142 : vector<64x64xf32>
    %144 = vector.extract_strided_slice %5 {offsets = [4, 3, 0], sizes = [8, 8, 3], strides = [1, 1, 1]} : vector<12x12x3xf32> to vector<8x8x3xf32>
    %145 = vector.shape_cast %144 : vector<8x8x3xf32> to vector<64x3xf32>
    %146 = vector.extract_strided_slice %6 {offsets = [4, 3, 0, 0], sizes = [1, 1, 3, 64], strides = [1, 1, 1, 1]} : vector<5x5x3x64xf32> to vector<1x1x3x64xf32>
    %147 = vector.shape_cast %146 : vector<1x1x3x64xf32> to vector<3x64xf32>
    %cst_38 = arith.constant dense<0.000000e+00> : vector<64x64xf32>
    %148 = tpu.matmul %145, %147, %cst_38 {dimension_numbers = #tpu.dot_dimension_numbers<[1], [0], [0], [1], [0, 0, 1, 1], [], []>} : vector<64x3xf32>, vector<3x64xf32>, vector<64x64xf32> -> vector<64x64xf32>
    %149 = arith.addf %143, %148 : vector<64x64xf32>
    %150 = vector.extract_strided_slice %5 {offsets = [4, 4, 0], sizes = [8, 8, 3], strides = [1, 1, 1]} : vector<12x12x3xf32> to vector<8x8x3xf32>
    %151 = vector.shape_cast %150 : vector<8x8x3xf32> to vector<64x3xf32>
    %152 = vector.extract_strided_slice %6 {offsets = [4, 4, 0, 0], sizes = [1, 1, 3, 64], strides = [1, 1, 1, 1]} : vector<5x5x3x64xf32> to vector<1x1x3x64xf32>
    %153 = vector.shape_cast %152 : vector<1x1x3x64xf32> to vector<3x64xf32>
    %cst_39 = arith.constant dense<0.000000e+00> : vector<64x64xf32>
    %154 = tpu.matmul %151, %153, %cst_39 {dimension_numbers = #tpu.dot_dimension_numbers<[1], [0], [0], [1], [0, 0, 1, 1], [], []>} : vector<64x3xf32>, vector<3x64xf32>, vector<64x64xf32> -> vector<64x64xf32>
    %155 = arith.addf %149, %154 : vector<64x64xf32>
    %c0_40 = arith.constant 0 : index
    %c0_41 = arith.constant 0 : index
    %156 = vector.load %arg3[%c0_40, %c0_41] : memref<1x64xf32, #tpu.memory_space<vmem>>, vector<1x64xf32>
    %157 = vector.broadcast %156 : vector<1x64xf32> to vector<64x64xf32>
    %158 = arith.addf %155, %157 : vector<64x64xf32>
    %159 = vector.shape_cast %158 : vector<64x64xf32> to vector<1x8x8x64xf32>
    %c0_42 = arith.constant 0 : index
    %c0_43 = arith.constant 0 : index
    %c0_44 = arith.constant 0 : index
    %c0_45 = arith.constant 0 : index
    %160 = vector.load %arg4[%c0_42, %c0_43, %c0_44, %c0_45] : memref<1x8x8x64xf32, #tpu.memory_space<vmem>>, vector<1x8x8x64xf32>
    tpu.vector_store %arg4[%c0_42, %c0_43, %c0_44, %c0_45], %159 {strides = array<i32>} : memref<1x8x8x64xf32, #tpu.memory_space<vmem>>, vector<1x8x8x64xf32>,
    return
  }
  func.func @transform_0(%arg0: i32) -> (i32, i32, i32, i32) {
    %c0_i32 = arith.constant 0 : i32
    %c0_i32_0 = arith.constant 0 : i32
    %c0_i32_1 = arith.constant 0 : i32
    %c0_i32_2 = arith.constant 0 : i32
    return %arg0, %c0_i32, %c0_i32_0, %c0_i32_1 : i32, i32, i32, i32
  }
  func.func @transform_1(%arg0: i32) -> (i32, i32, i32, i32) {
    %c0_i32 = arith.constant 0 : i32
    %c0_i32_0 = arith.constant 0 : i32
    %c0_i32_1 = arith.constant 0 : i32
    %c0_i32_2 = arith.constant 0 : i32
    %c0_i32_3 = arith.constant 0 : i32
    return %c0_i32, %c0_i32_0, %c0_i32_1, %c0_i32_2 : i32, i32, i32, i32
  }
  func.func @transform_2(%arg0: i32) -> (i32, i32) {
    %c0_i32 = arith.constant 0 : i32
    %c0_i32_0 = arith.constant 0 : i32
    %c0_i32_1 = arith.constant 0 : i32
    return %c0_i32, %c0_i32_0 : i32, i32
  }
  func.func @transform_3(%arg0: i32) -> (i32, i32, i32, i32) {
    %c0_i32 = arith.constant 0 : i32
    %c0_i32_0 = arith.constant 0 : i32
    %c0_i32_1 = arith.constant 0 : i32
    %c0_i32_2 = arith.constant 0 : i32
    return %arg0, %c0_i32, %c0_i32_0, %c0_i32_1 : i32, i32, i32, i32
  }
}

</mosaic_0001>

<bundles_post_ra>
// kernel: tpu_custom_call.1
= control target key start
LH: loop header
LB: loop body
LE: loop exit
PB: predicated region body
PF: predicated region fallthrough
CT: control target
= control target key end

     0   :  { %8 = vsyncpa [#allocation4], 0  ;;  %s3404_s0 = inlined_call_operand.vmem [shape: f32[2,8,8,3], index: 0, kind: input, shape index: {}]   ;;  %s3405_s1 = inlined_call_operand.vmem [shape: f32[5,5,3,64], index: 1, kind: input, shape index: {}]   ;;  %s3406_s2 = inlined_call_operand.vmem [shape: f32[1,64], index: 2, kind: input, shape index: {}]   ;;  %s3407_s3 = inlined_call_operand.hbm [shape: f32[2,8,8,64], index: 3, kind: output, shape index: {}]  }
   0x1   :  { %10 = vsyncpa [#allocation4 + $0x1], 0  ;;  %s2309_s12 = smov 0   ;;  %s2311_s13 = smov 0  }
   0x2   :  { %s2313_s14 = smov 0   ;;  %s2315_s15 = smov 0  }
   0x3 LB: > { %s2330_s16 = sadd.s32 4294967295, %s2284_s15   ;;  %s1937_s17 = sadd.s32 4294967294, %s2284_s15   ;;  %s2284_s15 = sphi %s2315_s15, %s3413_s15   ;;  %s2280_s14 = sphi %s2313_s14, %s3412_s14   ;;  %s2276_s13 = sphi %s2311_s13, %s3411_s13   ;;  %s2272_s12 = sphi %s2309_s12, %s3410_s12  }
   0x4   : > { %s2334_s18 = sadd.s32 1, %s2284_s15   ;;  %s91_s19 = sadd.s32 1, %s2280_s14 }
   0x5   : > { %s88_s20 = ssub.s32 %s2284_s15, %s2334_s18  ;;  %p101_p0 = scmp.ne.s32.totalorder %s2280_s14, %s2276_s13 }
   0x6   : > { %p89_p1 = scmp.eq.s32.totalorder %s88_s20, 0  ;;  %p102_p2 = scmp.eq.s32.totalorder %s2330_s16, 1 }
   0x7   : > { %p107_p3 = scmp.ne.s32.totalorder %s2276_s13, %s2272_s12  ;;  %p108_p4 = scmp.eq.s32.totalorder %s1937_s17, 1 }
   0x8   : > { %s2345_s21 = scalar_select %p89_p1, %s2280_s14, %s91_s19  }
   0x9   : > { %p2347_p5 = por %p102_p2, %p101_p0  ;;  %p2351_p6 = por %p108_p4, %p107_p3 }
   0xa   : > { %p1940_p7 = scmp.ge.s32.totalorder %s2284_s15, 1  ;;  %p140_p8 = scmp.lt.s32.totalorder %s2284_s15, 3 }
   0xc   : > { %p141_p9 = pnand %p1940_p7, %p140_p8 }
   0xd   : > { %p164_p10 = scmp.lt.s32.totalorder (!%p141_p9), %s2330_s16, 1  ;;  %s2175_s4 = sshll.u32 (!%p141_p9), %s2330_s16, 6 }
   0xe   : > { %144 = sbr.rel (%p141_p9) target bundleno = 592 (0x250), region = 32  ;;  %s1871_s7 = scalar_lea.hbm (!%p141_p9), %s3407_s3, %s2175_s4 }
   0xf   : > { %s1874_s9 = sshll.u32 (!%p141_p9), %s1871_s7, 4  ;;  %s2242_s20 = scalar_lea.hbm (!%p141_p9), %s3407_s3, 128  ;;  %s1875_s9 = int_to_ptr.hbm [resolvable:$true] %s1874_s9 }
  0x10   : > { %s2236_s10 = sshra.s32 (!%p141_p9), %s1875_s9, 4  ;;  %s2237_s10 = int_to_ptr.hbm [resolvable:$true] %s2236_s10 }
  0x11   : > { %s2238_s11 = scalar_lea.hbm (!%p141_p9), %s2237_s10, 64  ;;  %p2243_p0 = scmp.lt.s32.totalorder (!%p141_p9), %s2237_s10, %s3407_s3 }
  0x12   : > { %p2239_p11 = scmp.ne.s32.totalorder (!%p141_p9), %s2237_s10, %s2238_s11  ;;  %p2244_p1 = scmp.lt.s32.totalorder (!%p141_p9), %s2242_s20, %s2238_s11 }
  0x13   : > { %v237_v0 = vld [vmem:[%s3405_s1 + $0x4] sm:$0x7]  ;;  %vm318_vm0 = vcmask 1042432   ;;  %vm169_vm1 = vcmask 23552   ;;  %vm171_vm2 = vcmask 19456   ;;  %v2286_v1 = vmov 0.0  }
  0x14   : > { %2176 = vmatpush.msk.msra.mxu1 %vm318_vm0, %v237_v0  ;;  %2177 = vmatpush.msk.msra.mxu2 %vm318_vm0, %v237_v0  ;;  %175 = vst.msk [vmem:[#allocation2 + $0x20] sm:$0xff] %vm169_vm1, %v2286_v1  ;;  %s165_s26 = scalar_select %p164_p10, %s2330_s16, 1  ;;  %v238_v2 = vld [vmem:[%s3405_s1 + $0x8] sm:$0x7]  ;;  %v239_v4 = vld [vmem:[%s3405_s1 + $0xc] sm:$0x7] }
  0x15   : > { %176 = vst.msk [vmem:[#allocation2 + $0x28] sm:$0xf] %vm171_vm2, %v2286_v1  ;;  %2178 = vmatpush.msk.msra.mxu3 %vm318_vm0, %v237_v0  ;;  %1944 = vmatpush.msk.msra.mxu0 %vm318_vm0, %v237_v0  ;;  %v236_v5 = vld [vmem:[%s3405_s1] sm:$0x7]  ;;  %vm277_vm3 = vcmask 1046528   ;;  %vm609_vm4 = vcmask 1043456   ;;  %p2240_p12 = pnand %p2239_p11, %p2347_p5  ;;  %p2245_p2 = por %p2244_p1, %p2243_p0 }
  0x16   : > { %170 = vst.msk [vmem:[#allocation2] sm:$0xff] %vm169_vm1, %v2286_v1  ;;  %s2174_s27 = sshll.u32 %s165_s26, 6  ;;  %1962 = vmatpush.msk.msrb.mxu2 %vm318_vm0, %v238_v2  ;;  %1953 = vmatpush.msk.msrb.mxu1 %vm318_vm0, %v236_v5  ;;  %v240_v13 = vld [vmem:[%s3405_s1 + $0x10] sm:$0x7]  ;;  %v241_v22 = vld [vmem:[%s3405_s1 + $0x14] sm:$0x7] }
  0x17   : > { %172 = vst.msk [vmem:[#allocation2 + $0x8] sm:$0xf] %vm171_vm2, %v2286_v1  ;;  %s2373_s30 = scalar_lea.vmem %s3404_s0, %s2174_s27  ;;  %1971 = vmatpush.msk.msrb.mxu3 %vm318_vm0, %v239_v4  ;;  %1980 = vmatpush.msk.msrb.mxu0 %vm318_vm0, %v240_v13  ;;  %v244_v31 = vld [vmem:[%s3405_s1 + $0x20] sm:$0x7]  ;;  %v242_v34 = vld [vmem:[%s3405_s1 + $0x18] sm:$0x7]  ;;  %p2241_p13 = pneg %p2240_p12 }
  0x18   : > { %173 = vst.msk [vmem:[#allocation2 + $0x10] sm:$0xff] %vm169_vm1, %v2286_v1  ;;  %v195_v3 = vld [vmem:[%s2373_s30] sm:$0xff]  ;;  %v197_v23 = vld [vmem:[%s2373_s30 + $0x10] sm:$0xff]  ;;  %v196_v25 = vld [vmem:[%s2373_s30 + $0x8] sm:$0xff]  ;;  %vm423_vm5 = vcmask 1045504   ;;  %vm516_vm6 = vcmask 1044480  }
  0x19   : > { %174 = vst.msk [vmem:[#allocation2 + $0x18] sm:$0xf] %vm171_vm2, %v2286_v1  ;;  %v199_v24 = vld [vmem:[%s2373_s30 + $0x20] sm:$0xff]  ;;  %v198_v26 = vld [vmem:[%s2373_s30 + $0x18] sm:$0xff]  ;;  %v200_v27 = vld [vmem:[%s2373_s30 + $0x28] sm:$0xff]  ;;  %s161_s26 = sand.u32 1, %s2276_s13   ;;  %p2246_p3 = pnand %p2245_p2, %p2241_p13 }
  0x1a   : > { %204 = vst.msk [vmem:[#allocation2 + $0x22] sm:$0xff] %vm169_vm1, %v195_v3  ;;  %v243_v39 = vld [vmem:[%s3405_s1 + $0x1c] sm:$0x7]  ;;  %s1941_s27 = sshll.u32 %s161_s26, 6  ;;  %vm1850_vm7 = vcmask 523264   ;;  %s1860_s16 = scalar_lea.sflag [#allocation4], %s161_s26 }
  0x1b   : > { %177 = vst.msk [vmem:[#allocation2 + $0x30] sm:$0xff] %vm169_vm1, %v2286_v1  ;;  %s3322_s29 = scalar_lea.vmem [#allocation3], %s1941_s27 }
  0x1c   : > { %178 = vst.msk [vmem:[#allocation2 + $0x38] sm:$0xf] %vm171_vm2, %v2286_v1  ;;  %s1872_s8 = sshll.u32 %s3322_s29, 4  ;;  %s1873_s8 = int_to_ptr.vmem [resolvable:$true] %s1872_s8 }
  0x1d   : > { %179 = vst.msk [vmem:[#allocation2 + $0x40] sm:$0xff] %vm169_vm1, %v2286_v1  ;;  %v2395_v6 = vld [vmem:[#allocation2] sm:$0xff] }
  0x1e   : > { %180 = vst.msk [vmem:[#allocation2 + $0x48] sm:$0xf] %vm171_vm2, %v2286_v1  ;;  %v2397_v7 = vld [vmem:[#allocation2 + $0x8] sm:$0xf]  ;;  %v278_v8 = vrot.slane %v2395_v6, 1  ;;  %v610_v28 = vrot.slane %v2395_v6, 4 }
  0x1f   : > { %181 = vst.msk [vmem:[#allocation2 + $0x50] sm:$0xff] %vm169_vm1, %v2286_v1  ;;  %v279_v9 = vrot.slane %v2397_v7, 1  ;;  %v2426_v17 = vld [vmem:[#allocation2 + $0x10] sm:$0xff]  ;;  %v611_v29 = vrot.slane %v2397_v7, 4  ;;  %v424_v0 = vrot.slane %v2395_v6, 2  ;;  %v517_v2 = vrot.slane %v2395_v6, 3 }
  0x20   : > { %182 = vst.msk [vmem:[#allocation2 + $0x58] sm:$0xf] %vm171_vm2, %v2286_v1  ;;  %v2428_v18 = vld [vmem:[#allocation2 + $0x18] sm:$0xf]  ;;  %v281_v19 = vrot.slane %v2426_v17, 1  ;;  %v613_v55 = vrot.slane %v2426_v17, 4 }
  0x21   : > { %v2403_v10 = vld [vmem:[#allocation2 + $0x20] sm:$0xff]  ;;  %v2405_v11 = vld [vmem:[#allocation2 + $0x28] sm:$0xf]  ;;  %183 = vst.msk [vmem:[#allocation2 + $0x60] sm:$0xff] %vm169_vm1, %v2286_v1  ;;  %v280_v12 = vsel %vm277_vm3, %v278_v8, %v279_v9  ;;  %v282_v20 = vrot.slane %v2428_v18, 1  ;;  %v612_v30 = vsel %vm609_vm4, %v610_v28, %v611_v29  ;;  %v614_v58 = vrot.slane %v2428_v18, 4 }
  0x22   : > { %v284_v14 = vrot.slane %v2403_v10, 1  ;;  %v285_v15 = vrot.slane %v2405_v11, 1  ;;  %184 = vst.msk [vmem:[#allocation2 + $0x68] sm:$0xf] %vm171_vm2, %v2286_v1  ;;  %1945 = vmatmul.msk.f32.vlgmr.msra.gmra.mxu0 %vm169_vm1, %v280_v12  ;;  %v616_v62 = vrot.slane %v2403_v10, 4  ;;  %v617_v63 = vrot.slane %v2405_v11, 4 }
  0x23   : > { %185 = vst.msk [vmem:[#allocation2 + $0x70] sm:$0xff] %vm169_vm1, %v2286_v1  ;;  %v2436_v21 = vsel %vm277_vm3, %v281_v19, %v282_v20  ;;  %2016 = vmatpush.msk.msra.mxu0 %vm318_vm0, %v244_v31  ;;  %v2521_v59 = vsel %vm609_vm4, %v613_v55, %v614_v58  ;;  %v518_v3 = vrot.slane %v2397_v7, 3  ;;  %v520_v13 = vrot.slane %v2426_v17, 3 }
  0x24   : > { %v2419_v16 = vsel %vm277_vm3, %v284_v14, %v285_v15  ;;  %186 = vst.msk [vmem:[#allocation2 + $0x78] sm:$0xf] %vm171_vm2, %v2286_v1  ;;  %v2544_v4 = vsel %vm609_vm4, %v616_v62, %v617_v63  ;;  %v521_v14 = vrot.slane %v2428_v18, 3 }
  0x25   : > { %1947 = vmatmul.msk.f32.vlgmr.msra.gmra.mxu1 %vm169_vm1, %v2419_v16  ;;  %187 = vst.msk [vmem:[#allocation2 + $0x80] sm:$0xff] %vm169_vm1, %v2286_v1  ;;  %v519_v8 = vsel %vm516_vm6, %v517_v2, %v518_v3  ;;  %v247_v2 = vld [vmem:[%s3405_s1 + $0x2c] sm:$0x7]  ;;  %v245_v3 = vld [vmem:[%s3405_s1 + $0x24] sm:$0x7] }
  0x26   : > { %188 = vst.msk [vmem:[#allocation2 + $0x88] sm:$0xf] %vm171_vm2, %v2286_v1  ;;  %1989 = vmatpush.msk.msra.mxu1 %vm318_vm0, %v241_v22  ;;  %v2569_v20 = vsel %vm516_vm6, %v520_v13, %v521_v14  ;;  %v248_v13 = vld [vmem:[%s3405_s1 + $0x30] sm:$0x7] }
  0x27   : > { %189 = vst.msk [vmem:[#allocation2 + $0x90] sm:$0xff] %vm169_vm1, %v2286_v1 }
  0x28   : > { %190 = vst.msk [vmem:[#allocation2 + $0x98] sm:$0xf] %vm171_vm2, %v2286_v1 }
  0x29   : > { %191 = vst.msk [vmem:[#allocation2 + $0xa0] sm:$0xff] %vm169_vm1, %v2286_v1 }
  0x2a   : > { %192 = vst.msk [vmem:[#allocation2 + $0xa8] sm:$0xf] %vm171_vm2, %v2286_v1  ;;  %1946 = vmatmul.msk.f32.gmra.mxu0 %vm169_vm1, %v2436_v21 }
  0x2b   : > { %193 = vst.msk [vmem:[#allocation2 + $0xb0] sm:$0xff] %vm169_vm1, %v2286_v1 }
  0x2c   : > { %194 = vst.msk [vmem:[#allocation2 + $0xb8] sm:$0xf] %vm171_vm2, %v2286_v1  ;;  %v425_v1 = vrot.slane %v2397_v7, 2  ;;  %v428_v7 = vrot.slane %v2428_v18, 2  ;;  %v430_v18 = vrot.slane %v2403_v10, 2 }
  0x2d   : > { %206 = vst.msk [vmem:[#allocation2 + $0x42] sm:$0xff] %vm169_vm1, %v197_v23 }
  0x2e   : > { %208 = vst.msk [vmem:[#allocation2 + $0x62] sm:$0xff] %vm169_vm1, %v199_v24  ;;  %v426_v5 = vsel %vm423_vm5, %v424_v0, %v425_v1  ;;  %v431_v24 = vrot.slane %v2405_v11, 2 }
  0x2f   : > { %205 = vst.msk [vmem:[#allocation2 + $0x32] sm:$0xff] %vm169_vm1, %v196_v25  ;;  %v523_v25 = vrot.slane %v2403_v10, 3 }
  0x30   : > { %207 = vst.msk [vmem:[#allocation2 + $0x52] sm:$0xff] %vm169_vm1, %v198_v26  ;;  %v524_v26 = vrot.slane %v2405_v11, 3  ;;  %v2587_v28 = vsel %vm423_vm5, %v430_v18, %v431_v24 }
  0x31   : > { %209 = vst.msk [vmem:[#allocation2 + $0x72] sm:$0xff] %vm169_vm1, %v200_v27 }
  0x32   : > { %1981 = vmatmul.msk.f32.vlgmr.msrb.gmra.mxu0 %vm169_vm1, %v612_v30  ;;  %v2592_v29 = vsel %vm516_vm6, %v523_v25, %v524_v26 }
  0x33   : > { %2052 = vmatpush.msk.msrb.mxu0 %vm318_vm0, %v248_v13 }
  0x34   : > { %v2465_v32 = vld [vmem:[#allocation2 + $0x40] sm:$0xff]  ;;  %v2467_v33 = vld [vmem:[#allocation2 + $0x48] sm:$0xf] }
  0x35   : > { %v290_v35 = vrot.slane %v2465_v32, 1  ;;  %v291_v36 = vrot.slane %v2467_v33, 1  ;;  %v2474_v37 = vld [vmem:[#allocation2 + $0x60] sm:$0xff]  ;;  %v2476_v38 = vld [vmem:[#allocation2 + $0x68] sm:$0xf]  ;;  %v622_v22 = vrot.slane %v2465_v32, 4 }
  0x36   : > { %v296_v40 = vrot.slane %v2474_v37, 1  ;;  %v297_v41 = vrot.slane %v2476_v38, 1  ;;  %v2483_v42 = vld [vmem:[#allocation2 + $0x30] sm:$0xff]  ;;  %v2485_v43 = vld [vmem:[#allocation2 + $0x38] sm:$0xf]  ;;  %v623_v23 = vrot.slane %v2467_v33, 4 }
  0x37   : > { %v2488_v44 = vsel %vm277_vm3, %v290_v35, %v291_v36  ;;  %v287_v45 = vrot.slane %v2483_v42, 1  ;;  %v288_v46 = vrot.slane %v2485_v43, 1  ;;  %v2492_v47 = vld [vmem:[#allocation2 + $0x50] sm:$0xff]  ;;  %v2494_v48 = vld [vmem:[#allocation2 + $0x58] sm:$0xf]  ;;  %v619_v9 = vrot.slane %v2483_v42, 4 }
  0x38   : > { %1949 = vmatmul.msk.f32.vlgmr.msra.gmra.mxu2 %vm169_vm1, %v2488_v44  ;;  %v2499_v49 = vsel %vm277_vm3, %v296_v40, %v297_v41  ;;  %v2501_v50 = vld [vmem:[#allocation2 + $0x70] sm:$0xff]  ;;  %v2503_v51 = vld [vmem:[#allocation2 + $0x78] sm:$0xf]  ;;  %v293_v53 = vrot.slane %v2492_v47, 1  ;;  %v294_v54 = vrot.slane %v2494_v48, 1  ;;  %v620_v12 = vrot.slane %v2485_v43, 4 }
  0x39   : > { %1951 = vmatmul.msk.f32.vlgmr.msra.gmra.mxu3 %vm169_vm1, %v2499_v49  ;;  %v2508_v52 = vsel %vm277_vm3, %v287_v45, %v288_v46  ;;  %1998 = vmatpush.msk.msra.mxu2 %vm318_vm0, %v242_v34  ;;  %v299_v56 = vrot.slane %v2501_v50, 1  ;;  %v300_v57 = vrot.slane %v2503_v51, 1  ;;  %v2584_v27 = vsel %vm609_vm4, %v622_v22, %v623_v23 }
  0x3a   : > { %1948 = vmatmul.msk.f32.gmra.mxu1 %vm169_vm1, %v2508_v52  ;;  %2007 = vmatpush.msk.msra.mxu3 %vm318_vm0, %v243_v39  ;;  %v2524_v60 = vsel %vm277_vm3, %v293_v53, %v294_v54  ;;  %v2561_v15 = vsel %vm609_vm4, %v619_v9, %v620_v12  ;;  %v625_v30 = vrot.slane %v2492_v47, 4  ;;  %v626_v31 = vrot.slane %v2494_v48, 4 }
  0x3b   : > { %1982 = vmatmul.msk.f32.gmra.mxu0 %vm169_vm1, %v2521_v59  ;;  %v2529_v61 = vsel %vm277_vm3, %v299_v56, %v300_v57  ;;  %v433_v11 = vrot.slane %v2483_v42, 2  ;;  %v434_v34 = vrot.slane %v2485_v43, 2  ;;  %v526_v35 = vrot.slane %v2483_v42, 3 }
  0x3c   : > { %v527_v36 = vrot.slane %v2485_v43, 3  ;;  %v2607_v39 = vsel %vm609_vm4, %v625_v30, %v626_v31  ;;  %v628_v45 = vrot.slane %v2474_v37, 4  ;;  %v629_v46 = vrot.slane %v2476_v38, 4 }
  0x3d   : > { %v2610_v40 = vsel %vm423_vm5, %v433_v11, %v434_v34  ;;  %v436_v43 = vrot.slane %v2465_v32, 2  ;;  %v437_v53 = vrot.slane %v2467_v33, 2  ;;  %v529_v54 = vrot.slane %v2465_v32, 3 }
  0x3e   : > { %v2615_v41 = vsel %vm516_vm6, %v526_v35, %v527_v36  ;;  %v530_v55 = vrot.slane %v2467_v33, 3  ;;  %v2630_v56 = vsel %vm609_vm4, %v628_v45, %v629_v46  ;;  %v631_v62 = vrot.slane %v2501_v50, 4  ;;  %v246_v33 = vld [vmem:[%s3405_s1 + $0x28] sm:$0x7]  ;;  %v250_v35 = vld [vmem:[%s3405_s1 + $0x38] sm:$0x7] }
  0x3f   : > { %v2633_v57 = vsel %vm423_vm5, %v436_v43, %v437_v53  ;;  %v632_v63 = vrot.slane %v2503_v51, 4  ;;  %v439_v0 = vrot.slane %v2492_v47, 2  ;;  %v440_v1 = vrot.slane %v2494_v48, 2  ;;  %v251_v36 = vld [vmem:[%s3405_s1 + $0x3c] sm:$0x7] }
  0x40   : > { %1950 = vmatmul.msk.f32.gmra.mxu2 %vm169_vm1, %v2524_v60  ;;  %v2638_v58 = vsel %vm516_vm6, %v529_v54, %v530_v55  ;;  %v535_v14 = vrot.slane %v2474_v37, 3  ;;  %v536_v22 = vrot.slane %v2476_v38, 3  ;;  %v445_v24 = vrot.slane %v2501_v50, 2  ;;  %v249_v46 = vld [vmem:[%s3405_s1 + $0x34] sm:$0x7] }
  0x41   : > { %1952 = vmatmul.msk.f32.gmra.mxu3 %vm169_vm1, %v2529_v61  ;;  %v2663_v9 = vsel %vm609_vm4, %v631_v62, %v632_v63  ;;  %v2668_v12 = vsel %vm423_vm5, %v439_v0, %v440_v1  ;;  %v538_v25 = vrot.slane %v2501_v50, 3  ;;  %v252_v54 = vld [vmem:[%s3405_s1 + $0x40] sm:$0x7] }
  0x42   : > { %1954 = vmatmul.msk.f32.vlgmr.msrb.gmra.mxu1 %vm169_vm1, %v2395_v6  ;;  %v427_v6 = vrot.slane %v2426_v17, 2  ;;  %v2695_v18 = vsel %vm516_vm6, %v535_v14, %v536_v22 }
  0x43   : > { %1983 = vmatmul.msk.f32.gmra.mxu0 %vm169_vm1, %v2544_v4  ;;  %2025 = vmatpush.msk.msrb.mxu1 %vm318_vm0, %v245_v3 }
  0x44   : > { %v2564_v19 = vsel %vm423_vm5, %v427_v6, %v428_v7  ;;  %v443_v7 = vrot.slane %v2476_v38, 2  ;;  %v446_v38 = vrot.slane %v2503_v51, 2 }
  0x46   : > { %v2708_v26 = vsel %vm423_vm5, %v445_v24, %v446_v38 }
  0x48   : > { %1963 = vmatmul.msk.f32.vlgmr.msrb.gmra.mxu2 %vm169_vm1, %v426_v5  ;;  %v532_v5 = vrot.slane %v2492_v47, 3 }
  0x49   : > { %1972 = vmatmul.msk.f32.vlgmr.msrb.gmra.mxu3 %vm169_vm1, %v519_v8  ;;  %2034 = vmatpush.msk.msrb.mxu2 %vm318_vm0, %v246_v33  ;;  %v533_v8 = vrot.slane %v2494_v48, 3  ;;  %v442_v48 = vrot.slane %v2474_v37, 2 }
  0x4a   : > { %1955 = vmatmul.msk.f32.gmra.mxu1 %vm169_vm1, %v2426_v17  ;;  %2043 = vmatpush.msk.msrb.mxu3 %vm318_vm0, %v247_v2 }
  0x4b   : > { %1984 = vmatmul.msk.f32.gmra.mxu0 %vm169_vm1, %v2561_v15  ;;  %v2673_v6 = vsel %vm516_vm6, %v532_v5, %v533_v8  ;;  %v2690_v23 = vsel %vm423_vm5, %v442_v48, %v443_v7 }
  0x50   : > { %1964 = vmatmul.msk.f32.gmra.mxu2 %vm169_vm1, %v2564_v19 }
  0x51   : > { %1973 = vmatmul.msk.f32.gmra.mxu3 %vm169_vm1, %v2569_v20 }
  0x52   : > { %1956 = vmatmul.msk.f32.gmra.mxu1 %vm169_vm1, %v2403_v10 }
  0x53   : > { %1985 = vmatmul.msk.f32.gmra.mxu0 %vm169_vm1, %v2584_v27 }
  0x58   : > { %1965 = vmatmul.msk.f32.gmra.mxu2 %vm169_vm1, %v2587_v28 }
  0x59   : > { %1974 = vmatmul.msk.f32.gmra.mxu3 %vm169_vm1, %v2592_v29 }
  0x5a   : > { %1957 = vmatmul.msk.f32.gmra.mxu1 %vm169_vm1, %v2483_v42 }
  0x5b   : > { %1986 = vmatmul.msk.f32.gmra.mxu0 %vm169_vm1, %v2607_v39 }
  0x60   : > { %1966 = vmatmul.msk.f32.gmra.mxu2 %vm169_vm1, %v2610_v40 }
  0x61   : > { %1975 = vmatmul.msk.f32.gmra.mxu3 %vm169_vm1, %v2615_v41 }
  0x62   : > { %1958 = vmatmul.msk.f32.gmra.mxu1 %vm169_vm1, %v2465_v32 }
  0x63   : > { %1987 = vmatmul.msk.f32.gmra.mxu0 %vm169_vm1, %v2630_v56 }
  0x68   : > { %1967 = vmatmul.msk.f32.gmra.mxu2 %vm169_vm1, %v2633_v57 }
  0x69   : > { %1976 = vmatmul.msk.f32.gmra.mxu3 %vm169_vm1, %v2638_v58 }
  0x6a   : > { %1959 = vmatmul.msk.f32.gmra.mxu1 %vm169_vm1, %v2492_v47 }
  0x6b   : > { %1988 = vmatmul.msk.f32.gmra.mxu0 %vm169_vm1, %v2663_v9 }
  0x70   : > { %1968 = vmatmul.msk.f32.gmra.mxu2 %vm169_vm1, %v2668_v12 }
  0x71   : > { %1977 = vmatmul.msk.f32.gmra.mxu3 %vm169_vm1, %v2673_v6 }
  0x72   : > { %1960 = vmatmul.msk.f32.gmra.mxu1 %vm169_vm1, %v2474_v37 }
  0x73   : > { %2017 = vmatmul.msk.f32.vlgmr.msra.gmra.mxu0 %vm169_vm1, %v2569_v20  ;;  %v539_v20 = vrot.slane %v2503_v51, 3 }
  0x74   : > { %2088 = vmatpush.msk.msra.mxu0 %vm318_vm0, %v252_v54 }
  0x75   : > { %v2713_v30 = vsel %vm516_vm6, %v538_v25, %v539_v20 }
  0x78   : > { %1969 = vmatmul.msk.f32.gmra.mxu2 %vm169_vm1, %v2690_v23 }
  0x79   : > { %1978 = vmatmul.msk.f32.gmra.mxu3 %vm169_vm1, %v2695_v18 }
  0x7a   : > { %1961 = vmatmul.msk.f32.gmra.mxu1 %vm169_vm1, %v2501_v50 }
  0x7b   : > { %2018 = vmatmul.msk.f32.gmra.mxu0 %vm169_vm1, %v2592_v29 }
  0x80   : > { %1970 = vmatmul.msk.f32.gmra.mxu2 %vm169_vm1, %v2708_v26 }
  0x81   : > { %1979 = vmatmul.msk.f32.gmra.mxu3 %vm169_vm1, %v2713_v30 }
  0x82   : > { %1990 = vmatmul.msk.f32.vlgmr.msra.gmra.mxu1 %vm169_vm1, %v2426_v17  ;;  %v201_v17 = vld [vmem:[%s2373_s30 + $0x30] sm:$0xff] }
  0x83   : > { %2019 = vmatmul.msk.f32.gmra.mxu0 %vm169_vm1, %v2615_v41  ;;  %210 = vst.msk [vmem:[#allocation2 + $0x82] sm:$0xff] %vm169_vm1, %v201_v17  ;;  %2061 = vmatpush.msk.msra.mxu1 %vm318_vm0, %v249_v46  ;;  %v202_v46 = vld [vmem:[%s2373_s30 + $0x38] sm:$0xff] }
  0x84   : > { %211 = vst.msk [vmem:[#allocation2 + $0x92] sm:$0xff] %vm169_vm1, %v202_v46 }
  0x88   : > { %1999 = vmatmul.msk.f32.vlgmr.msra.gmra.mxu2 %vm169_vm1, %v2436_v21 }
  0x89   : > { %2008 = vmatmul.msk.f32.vlgmr.msra.gmra.mxu3 %vm169_vm1, %v2564_v19  ;;  %2070 = vmatpush.msk.msra.mxu2 %vm318_vm0, %v250_v35 }
  0x8a   : > { %1991 = vmatmul.msk.f32.gmra.mxu1 %vm169_vm1, %v2403_v10  ;;  %v2757_v51 = vld [vmem:[#allocation2 + $0x80] sm:$0xff]  ;;  %v2759_v19 = vld [vmem:[#allocation2 + $0x88] sm:$0xf]  ;;  %2079 = vmatpush.msk.msra.mxu3 %vm318_vm0, %v251_v36 }
  0x8b   : > { %2020 = vmatmul.msk.f32.gmra.mxu0 %vm169_vm1, %v2638_v58  ;;  %v872_v11 = vrot.slane %v2757_v51, 3  ;;  %v873_v34 = vrot.slane %v2759_v19, 3  ;;  %v758_v62 = vrot.slane %v2757_v51, 1  ;;  %v759_v63 = vrot.slane %v2759_v19, 1 }
  0x8c   : > { %v815_v33 = vrot.slane %v2757_v51, 2  ;;  %v816_v0 = vrot.slane %v2759_v19, 2 }
  0x8d   : > { %v2777_v45 = vsel %vm516_vm6, %v872_v11, %v873_v34  ;;  %v2815_v3 = vsel %vm277_vm3, %v758_v62, %v759_v63 }
  0x8e   : > { %v2820_v5 = vsel %vm423_vm5, %v815_v33, %v816_v0 }
  0x90   : > { %2000 = vmatmul.msk.f32.gmra.mxu2 %vm169_vm1, %v2419_v16 }
  0x91   : > { %2009 = vmatmul.msk.f32.gmra.mxu3 %vm169_vm1, %v2587_v28 }
  0x92   : > { %1992 = vmatmul.msk.f32.gmra.mxu1 %vm169_vm1, %v2483_v42 }
  0x93   : > { %2021 = vmatmul.msk.f32.gmra.mxu0 %vm169_vm1, %v2673_v6 }
  0x98   : > { %2001 = vmatmul.msk.f32.gmra.mxu2 %vm169_vm1, %v2508_v52 }
  0x99   : > { %2010 = vmatmul.msk.f32.gmra.mxu3 %vm169_vm1, %v2610_v40 }
  0x9a   : > { %1993 = vmatmul.msk.f32.gmra.mxu1 %vm169_vm1, %v2465_v32 }
  0x9b   : > { %2022 = vmatmul.msk.f32.gmra.mxu0 %vm169_vm1, %v2695_v18 }
  0x9f   : > { %v339_v21 = vpop.f32.mrf.mxu0 }
  0xa0   : > { %2002 = vmatmul.msk.f32.gmra.mxu2 %vm169_vm1, %v2488_v44 }
  0xa1   : > { %2011 = vmatmul.msk.f32.gmra.mxu3 %vm169_vm1, %v2633_v57 }
  0xa2   : > { %1994 = vmatmul.msk.f32.gmra.mxu1 %vm169_vm1, %v2492_v47  ;;  %v345_v43 = vpop.f32.mrf.mxu1 }
  0xa3   : > { %2023 = vmatmul.msk.f32.gmra.mxu0 %vm169_vm1, %v2713_v30 }
  0xa7   : > { %v342_v31 = vpop.f32.mrf.mxu0 }
  0xa8   : > { %2003 = vmatmul.msk.f32.gmra.mxu2 %vm169_vm1, %v2524_v60 }
  0xa9   : > { %2012 = vmatmul.msk.f32.gmra.mxu3 %vm169_vm1, %v2668_v12 }
  0xaa   : > { %1995 = vmatmul.msk.f32.gmra.mxu1 %vm169_vm1, %v2474_v37 }
  0xab   : > { %2024 = vmatmul.msk.f32.gmra.mxu0 %vm169_vm1, %v2777_v45 }
  0xaf   : > { %v670_v53 = vpop.f32.mrf.mxu0 }
  0xb0   : > { %2004 = vmatmul.msk.f32.gmra.mxu2 %vm169_vm1, %v2499_v49 }
  0xb1   : > { %2013 = vmatmul.msk.f32.gmra.mxu3 %vm169_vm1, %v2690_v23 }
  0xb2   : > { %1996 = vmatmul.msk.f32.gmra.mxu1 %vm169_vm1, %v2501_v50 }
  0xb3   : > { %2053 = vmatmul.msk.f32.vlgmr.msrb.gmra.mxu0 %vm169_vm1, %v2587_v28 }
  0xb7   : > { %v2798_v55 = vpop.f32.mrf.mxu1 }
  0xb8   : > { %2005 = vmatmul.msk.f32.gmra.mxu2 %vm169_vm1, %v2529_v61  ;;  %v673_v28 = vpop.f32.mrf.mxu0 }
  0xb9   : > { %2014 = vmatmul.msk.f32.gmra.mxu3 %vm169_vm1, %v2708_v26 }
  0xba   : > { %1997 = vmatmul.msk.f32.gmra.mxu1 %vm169_vm1, %v2757_v51 }
  0xbb   : > { %v2810_v1 = vpop.f32.mrf.mxu2  ;;  %2054 = vmatmul.msk.f32.gmra.mxu0 %vm169_vm1, %v2610_v40 }
  0xbc   : > { %v2812_v2 = vpop.f32.mrf.mxu3 }
  0xbf   : > { %v399_v8 = vpop.f32.mrf.mxu1 }
  0xc0   : > { %2006 = vmatmul.msk.f32.gmra.mxu2 %vm169_vm1, %v2815_v3  ;;  %v676_v48 = vpop.f32.mrf.mxu0  ;;  %v400_v22 = vadd.f32 %v399_v8, %v339_v21 }
  0xc1   : > { %2015 = vmatmul.msk.f32.gmra.mxu3 %vm169_vm1, %v2820_v5 }
  0xc2   : > { %2026 = vmatmul.msk.f32.vlgmr.msrb.gmra.mxu1 %vm169_vm1, %v2521_v59 }
  0xc3   : > { %v2828_v7 = vpop.f32.mrf.mxu2  ;;  %2055 = vmatmul.msk.f32.gmra.mxu0 %vm169_vm1, %v2633_v57 }
  0xc4   : > { %v2830_v13 = vpop.f32.mrf.mxu3 }
  0xc7   : > { %v402_v14 = vpop.f32.mrf.mxu1 }
  0xc8   : > { %2035 = vmatmul.msk.f32.vlgmr.msrb.gmra.mxu2 %vm169_vm1, %v2403_v10  ;;  %v679_v59 = vpop.f32.mrf.mxu0  ;;  %v403_v10 = vadd.f32 %v402_v14, %v342_v31 }
  0xc9   : > { %2044 = vmatmul.msk.f32.vlgmr.msrb.gmra.mxu3 %vm169_vm1, %v2419_v16 }
  0xca   : > { %2027 = vmatmul.msk.f32.gmra.mxu1 %vm169_vm1, %v2544_v4 }
  0xcb   : > { %v484_v24 = vpop.f32.mrf.mxu2  ;;  %2056 = vmatmul.msk.f32.gmra.mxu0 %vm169_vm1, %v2668_v12 }
  0xcc   : > { %v508_v38 = vadd.f32 %v484_v24, %v400_v22  ;;  %v577_v25 = vpop.f32.mrf.mxu3 }
  0xce   : > { %v601_v20 = vadd.f32 %v577_v25, %v508_v38 }
  0xcf   : > { %v405_v17 = vpop.f32.mrf.mxu1 }
  0xd0   : > { %v2842_v11 = vadd.f32 %v670_v53, %v601_v20  ;;  %2036 = vmatmul.msk.f32.gmra.mxu2 %vm169_vm1, %v2483_v42  ;;  %v682_v16 = vpop.f32.mrf.mxu0  ;;  %v406_v31 = vadd.f32 %v405_v17, %v345_v43  ;;  %v2875_v20 = vld [vmem:[#allocation2 + $0x90] sm:$0xff]  ;;  %v2877_v17 = vld [vmem:[#allocation2 + $0x98] sm:$0xf] }
  0xd1   : > { %2045 = vmatmul.msk.f32.gmra.mxu3 %vm169_vm1, %v2508_v52 }
  0xd2   : > { %2028 = vmatmul.msk.f32.gmra.mxu1 %vm169_vm1, %v2561_v15 }
  0xd3   : > { %v487_v21 = vpop.f32.mrf.mxu2  ;;  %2057 = vmatmul.msk.f32.gmra.mxu0 %vm169_vm1, %v2690_v23 }
  0xd4   : > { %v509_v34 = vadd.f32 %v487_v21, %v403_v10  ;;  %v580_v35 = vpop.f32.mrf.mxu3  ;;  %v1099_v21 = vrot.slane %v2875_v20, 2 }
  0xd6   : > { %v602_v36 = vadd.f32 %v580_v35, %v509_v34  ;;  %v254_v35 = vld [vmem:[%s3405_s1 + $0x48] sm:$0x7] }
  0xd7   : > { %v408_v53 = vpop.f32.mrf.mxu1  ;;  %2106 = vmatpush.msk.msrb.mxu2 %vm318_vm0, %v254_v35 }
  0xd8   : > { %v2854_v54 = vadd.f32 %v673_v28, %v602_v36  ;;  %2037 = vmatmul.msk.f32.gmra.mxu2 %vm169_vm1, %v2465_v32  ;;  %v685_v62 = vpop.f32.mrf.mxu0  ;;  %v409_v43 = vadd.f32 %v408_v53, %v2798_v55  ;;  %v1100_v55 = vrot.slane %v2877_v17, 2  ;;  %v255_v36 = vld [vmem:[%s3405_s1 + $0x4c] sm:$0x7] }
  0xd9   : > { %2046 = vmatmul.msk.f32.gmra.mxu3 %vm169_vm1, %v2488_v44 }
  0xda   : > { %2029 = vmatmul.msk.f32.gmra.mxu1 %vm169_vm1, %v2584_v27  ;;  %v2898_v53 = vsel %vm423_vm5, %v1099_v21, %v1100_v55  ;;  %2115 = vmatpush.msk.msrb.mxu3 %vm318_vm0, %v255_v36 }
  0xdb   : > { %v490_v63 = vpop.f32.mrf.mxu2  ;;  %2058 = vmatmul.msk.f32.gmra.mxu0 %vm169_vm1, %v2708_v26 }
  0xdc   : > { %v510_v33 = vadd.f32 %v490_v63, %v406_v31  ;;  %v583_v0 = vpop.f32.mrf.mxu3 }
  0xde   : > { %v603_v8 = vadd.f32 %v583_v0, %v510_v33  ;;  %v253_v0 = vld [vmem:[%s3405_s1 + $0x44] sm:$0x7] }
  0xdf   : > { %v411_v28 = vpop.f32.mrf.mxu1  ;;  %2097 = vmatpush.msk.msrb.mxu1 %vm318_vm0, %v253_v0 }
  0xe0   : > { %v2864_v14 = vadd.f32 %v676_v48, %v603_v8  ;;  %2038 = vmatmul.msk.f32.gmra.mxu2 %vm169_vm1, %v2492_v47  ;;  %v688_v22 = vpop.f32.mrf.mxu0  ;;  %v412_v46 = vadd.f32 %v411_v28, %v2810_v1 }
  0xe1   : > { %2047 = vmatmul.msk.f32.gmra.mxu3 %vm169_vm1, %v2524_v60 }
  0xe2   : > { %2030 = vmatmul.msk.f32.gmra.mxu1 %vm169_vm1, %v2607_v39 }
  0xe3   : > { %v493_v24 = vpop.f32.mrf.mxu2  ;;  %2059 = vmatmul.msk.f32.gmra.mxu0 %vm169_vm1, %v2820_v5 }
  0xe4   : > { %v511_v38 = vadd.f32 %v493_v24, %v409_v43  ;;  %v586_v25 = vpop.f32.mrf.mxu3  ;;  %v256_v43 = vld [vmem:[%s3405_s1 + $0x50] sm:$0x7] }
  0xe5   : > { %2124 = vmatpush.msk.msrb.mxu0 %vm318_vm0, %v256_v43 }
  0xe6   : > { %v604_v48 = vadd.f32 %v586_v25, %v511_v38  ;;  %v929_v25 = vrot.slane %v2757_v51, 4 }
  0xe7   : > { %v414_v10 = vpop.f32.mrf.mxu1 }
  0xe8   : > { %v2881_v34 = vadd.f32 %v679_v59, %v604_v48  ;;  %2039 = vmatmul.msk.f32.gmra.mxu2 %vm169_vm1, %v2474_v37  ;;  %v691_v59 = vpop.f32.mrf.mxu0  ;;  %v415_v24 = vadd.f32 %v414_v10, %v2828_v7  ;;  %v930_v48 = vrot.slane %v2759_v19, 4 }
  0xe9   : > { %2048 = vmatmul.msk.f32.gmra.mxu3 %vm169_vm1, %v2499_v49 }
  0xea   : > { %2031 = vmatmul.msk.f32.gmra.mxu1 %vm169_vm1, %v2630_v56  ;;  %v2925_v7 = vsel %vm609_vm4, %v929_v25, %v930_v48 }
  0xeb   : > { %v496_v31 = vpop.f32.mrf.mxu2  ;;  %2060 = vmatmul.msk.f32.gmra.mxu0 %vm169_vm1, %v2898_v53 }
  0xec   : > { %v512_v63 = vadd.f32 %v496_v31, %v412_v46  ;;  %v589_v33 = vpop.f32.mrf.mxu3  ;;  %v1043_v46 = vrot.slane %v2877_v17, 1 }
  0xee   : > { %v605_v1 = vadd.f32 %v589_v33, %v512_v63 }
  0xef   : > { %v417_v8 = vpop.f32.mrf.mxu1 }
  0xf0   : > { %v2907_v28 = vadd.f32 %v682_v16, %v605_v1  ;;  %2040 = vmatmul.msk.f32.gmra.mxu2 %vm169_vm1, %v2501_v50  ;;  %v897_v38 = vpop.f32.mrf.mxu0  ;;  %v418_v19 = vadd.f32 %v417_v8, %v2812_v2 }
  0xf1   : > { %2049 = vmatmul.msk.f32.gmra.mxu3 %vm169_vm1, %v2529_v61 }
  0xf2   : > { %2032 = vmatmul.msk.f32.gmra.mxu1 %vm169_vm1, %v2663_v9 }
  0xf3   : > { %v499_v16 = vpop.f32.mrf.mxu2  ;;  %2089 = vmatmul.msk.f32.vlgmr.msra.gmra.mxu0 %vm169_vm1, %v2508_v52  ;;  %v1042_v52 = vrot.slane %v2875_v20, 1 }
  0xf4   : > { %v513_v21 = vadd.f32 %v499_v16, %v415_v24  ;;  %v592_v55 = vpop.f32.mrf.mxu3 }
  0xf5   : > { %v2941_v1 = vsel %vm277_vm3, %v1042_v52, %v1043_v46 }
  0xf6   : > { %v606_v35 = vadd.f32 %v592_v55, %v513_v21 }
  0xf7   : > { %v420_v36 = vpop.f32.mrf.mxu1 }
  0xf8   : > { %v2927_v10 = vadd.f32 %v685_v62, %v606_v35  ;;  %2041 = vmatmul.msk.f32.gmra.mxu2 %vm169_vm1, %v2757_v51  ;;  %v900_v31 = vpop.f32.mrf.mxu0  ;;  %v421_v8 = vadd.f32 %v420_v36, %v2830_v13 }
  0xf9   : > { %2050 = vmatmul.msk.f32.gmra.mxu3 %vm169_vm1, %v2815_v3 }
  0xfa   : > { %2033 = vmatmul.msk.f32.gmra.mxu1 %vm169_vm1, %v2925_v7 }
  0xfb   : > { %v502_v63 = vpop.f32.mrf.mxu2  ;;  %2090 = vmatmul.msk.f32.gmra.mxu0 %vm169_vm1, %v2488_v44 }
  0xfc   : > { %v514_v33 = vadd.f32 %v502_v63, %v418_v19  ;;  %v595_v62 = vpop.f32.mrf.mxu3 }
  0xfe   : > { %v607_v0 = vadd.f32 %v595_v62, %v514_v33 }
  0xff   : > { %v725_v43 = vpop.f32.mrf.mxu1 }
 0x100   : > { %v2943_v2 = vadd.f32 %v688_v22, %v607_v0  ;;  %2042 = vmatmul.msk.f32.gmra.mxu2 %vm169_vm1, %v2875_v20  ;;  %v903_v24 = vpop.f32.mrf.mxu0  ;;  %v749_v13 = vadd.f32 %v725_v43, %v2842_v11 }
 0x101   : > { %2051 = vmatmul.msk.f32.gmra.mxu3 %vm169_vm1, %v2941_v1 }
 0x102   : > { %2062 = vmatmul.msk.f32.vlgmr.msra.gmra.mxu1 %vm169_vm1, %v2592_v29 }
 0x103   : > { %v505_v16 = vpop.f32.mrf.mxu2  ;;  %2091 = vmatmul.msk.f32.gmra.mxu0 %vm169_vm1, %v2524_v60 }
 0x104   : > { %v515_v25 = vadd.f32 %v505_v16, %v421_v8  ;;  %v598_v48 = vpop.f32.mrf.mxu3 }
 0x106   : > { %v608_v22 = vadd.f32 %v598_v48, %v515_v25 }
 0x107   : > { %v728_v21 = vpop.f32.mrf.mxu1 }
 0x108   : > { %v2954_v55 = vadd.f32 %v691_v59, %v608_v22  ;;  %2071 = vmatmul.msk.f32.vlgmr.msra.gmra.mxu2 %vm169_vm1, %v2544_v4  ;;  %v906_v29 = vpop.f32.mrf.mxu0 }
 0x109   : > { %2080 = vmatmul.msk.f32.vlgmr.msra.gmra.mxu3 %vm169_vm1, %v2483_v42  ;;  %v750_v42 = vadd.f32 %v728_v21, %v2854_v54 }
 0x10a   : > { %2063 = vmatmul.msk.f32.gmra.mxu1 %vm169_vm1, %v2615_v41 }
 0x10b   : > { %v783_v35 = vpop.f32.mrf.mxu2  ;;  %2092 = vmatmul.msk.f32.gmra.mxu0 %vm169_vm1, %v2499_v49 }
 0x10c   : > { %v807_v36 = vadd.f32 %v783_v35, %v749_v13  ;;  %v840_v19 = vpop.f32.mrf.mxu3 }
 0x10e   : > { %v864_v59 = vadd.f32 %v840_v19, %v807_v36  ;;  %v2998_v19 = vld [vmem:[#allocation2 + $0xa0] sm:$0xff] }
 0x10f   : > { %v731_v52 = vpop.f32.mrf.mxu1 }
 0x110   : > { %v2965_v46 = vadd.f32 %v897_v38, %v864_v59  ;;  %2072 = vmatmul.msk.f32.gmra.mxu2 %vm169_vm1, %v2561_v15  ;;  %v909_v4 = vpop.f32.mrf.mxu0  ;;  %v751_v54 = vadd.f32 %v731_v52, %v2864_v14  ;;  %v3000_v59 = vld [vmem:[#allocation2 + $0xa8] sm:$0xf] }
 0x111   : > { %2081 = vmatmul.msk.f32.gmra.mxu3 %vm169_vm1, %v2465_v32 }
 0x112   : > { %2064 = vmatmul.msk.f32.gmra.mxu1 %vm169_vm1, %v2638_v58 }
 0x113   : > { %v786_v11 = vpop.f32.mrf.mxu2  ;;  %2093 = vmatmul.msk.f32.gmra.mxu0 %vm169_vm1, %v2529_v61 }
 0x114   : > { %v808_v63 = vadd.f32 %v786_v11, %v750_v42  ;;  %v843_v33 = vpop.f32.mrf.mxu3  ;;  %v1326_v42 = vrot.slane %v2998_v19, 1 }
 0x116   : > { %v865_v38 = vadd.f32 %v843_v33, %v808_v63  ;;  %v258_v63 = vld [vmem:[%s3405_s1 + $0x58] sm:$0x7]  ;;  %v259_v33 = vld [vmem:[%s3405_s1 + $0x5c] sm:$0x7] }
 0x117   : > { %v734_v62 = vpop.f32.mrf.mxu1  ;;  %2142 = vmatpush.msk.msra.mxu2 %vm318_vm0, %v258_v63  ;;  %2151 = vmatpush.msk.msra.mxu3 %vm318_vm0, %v259_v33 }
 0x118   : > { %v2976_v0 = vadd.f32 %v900_v31, %v865_v38  ;;  %2073 = vmatmul.msk.f32.gmra.mxu2 %vm169_vm1, %v2584_v27  ;;  %v912_v43 = vpop.f32.mrf.mxu0  ;;  %v752_v14 = vadd.f32 %v734_v62, %v2881_v34  ;;  %v1327_v34 = vrot.slane %v3000_v59, 1 }
 0x119   : > { %2082 = vmatmul.msk.f32.gmra.mxu3 %vm169_vm1, %v2492_v47 }
 0x11a   : > { %2065 = vmatmul.msk.f32.gmra.mxu1 %vm169_vm1, %v2673_v6  ;;  %v3021_v62 = vsel %vm277_vm3, %v1326_v42, %v1327_v34 }
 0x11b   : > { %v789_v8 = vpop.f32.mrf.mxu2  ;;  %2094 = vmatmul.msk.f32.gmra.mxu0 %vm169_vm1, %v2815_v3 }
 0x11c   : > { %v809_v16 = vadd.f32 %v789_v8, %v751_v54  ;;  %v846_v25 = vpop.f32.mrf.mxu3 }
 0x11e   : > { %v866_v31 = vadd.f32 %v846_v25, %v809_v16  ;;  %v257_v25 = vld [vmem:[%s3405_s1 + $0x54] sm:$0x7] }
 0x11f   : > { %v737_v48 = vpop.f32.mrf.mxu1  ;;  %2133 = vmatpush.msk.msra.mxu1 %vm318_vm0, %v257_v25 }
 0x120   : > { %v2987_v22 = vadd.f32 %v903_v24, %v866_v31  ;;  %2074 = vmatmul.msk.f32.gmra.mxu2 %vm169_vm1, %v2607_v39  ;;  %v915_v21 = vpop.f32.mrf.mxu0  ;;  %v753_v38 = vadd.f32 %v737_v48, %v2907_v28 }
 0x121   : > { %2083 = vmatmul.msk.f32.gmra.mxu3 %vm169_vm1, %v2474_v37 }
 0x122   : > { %2066 = vmatmul.msk.f32.gmra.mxu1 %vm169_vm1, %v2695_v18 }
 0x123   : > { %v792_v13 = vpop.f32.mrf.mxu2  ;;  %2095 = vmatmul.msk.f32.gmra.mxu0 %vm169_vm1, %v2941_v1 }
 0x124   : > { %v810_v35 = vadd.f32 %v792_v13, %v752_v14  ;;  %v849_v36 = vpop.f32.mrf.mxu3  ;;  %v260_v14 = vld [vmem:[%s3405_s1 + $0x60] sm:$0x7] }
 0x125   : > { %2160 = vmatpush.msk.msra.mxu0 %vm318_vm0, %v260_v14 }
 0x126   : > { %v867_v24 = vadd.f32 %v849_v36, %v810_v35  ;;  %v1156_v36 = vrot.slane %v2875_v20, 3 }
 0x127   : > { %v740_v52 = vpop.f32.mrf.mxu1 }
 0x128   : > { %v3004_v11 = vadd.f32 %v906_v29, %v867_v24  ;;  %2075 = vmatmul.msk.f32.gmra.mxu2 %vm169_vm1, %v2630_v56  ;;  %v918_v29 = vpop.f32.mrf.mxu0  ;;  %v754_v13 = vadd.f32 %v740_v52, %v2927_v10  ;;  %v1157_v24 = vrot.slane %v2877_v17, 3 }
 0x129   : > { %2084 = vmatmul.msk.f32.gmra.mxu3 %vm169_vm1, %v2501_v50 }
 0x12a   : > { %2067 = vmatmul.msk.f32.gmra.mxu1 %vm169_vm1, %v2713_v30  ;;  %v3048_v10 = vsel %vm516_vm6, %v1156_v36, %v1157_v24 }
 0x12b   : > { %v795_v54 = vpop.f32.mrf.mxu2  ;;  %2096 = vmatmul.msk.f32.gmra.mxu0 %vm169_vm1, %v3021_v62 }
 0x12c   : > { %v811_v8 = vadd.f32 %v795_v54, %v753_v38  ;;  %v852_v16 = vpop.f32.mrf.mxu3  ;;  %v1213_v38 = vrot.slane %v2875_v20, 4  ;;  %v1214_v54 = vrot.slane %v2877_v17, 4 }
 0x12e   : > { %v868_v28 = vadd.f32 %v852_v16, %v811_v8 }
 0x12f   : > { %v743_v31 = vpop.f32.mrf.mxu1 }
 0x130   : > { %v3030_v48 = vadd.f32 %v909_v4, %v868_v28  ;;  %2076 = vmatmul.msk.f32.gmra.mxu2 %vm169_vm1, %v2663_v9  ;;  %v1124_v35 = vpop.f32.mrf.mxu0  ;;  %v755_v8 = vadd.f32 %v743_v31, %v2943_v2  ;;  %v3062_v28 = vsel %vm609_vm4, %v1213_v38, %v1214_v54 }
 0x131   : > { %2085 = vmatmul.msk.f32.gmra.mxu3 %vm169_vm1, %v2757_v51 }
 0x132   : > { %2068 = vmatmul.msk.f32.gmra.mxu1 %vm169_vm1, %v2777_v45 }
 0x133   : > { %v798_v4 = vpop.f32.mrf.mxu2  ;;  %2125 = vmatmul.msk.f32.vlgmr.msrb.gmra.mxu0 %vm169_vm1, %v2465_v32 }
 0x134   : > { %v812_v42 = vadd.f32 %v798_v4, %v754_v13  ;;  %v855_v34 = vpop.f32.mrf.mxu3 }
 0x136   : > { %v869_v63 = vadd.f32 %v855_v34, %v812_v42 }
 0x137   : > { %v746_v33 = vpop.f32.mrf.mxu1 }
 0x138   : > { %v3050_v52 = vadd.f32 %v912_v43, %v869_v63  ;;  %2077 = vmatmul.msk.f32.gmra.mxu2 %vm169_vm1, %v2925_v7  ;;  %v1127_v32 = vpop.f32.mrf.mxu0  ;;  %v756_v17 = vadd.f32 %v746_v33, %v2954_v55 }
 0x139   : > { %2086 = vmatmul.msk.f32.gmra.mxu3 %vm169_vm1, %v2875_v20 }
 0x13a   : > { %2069 = vmatmul.msk.f32.gmra.mxu1 %vm169_vm1, %v3048_v10 }
 0x13b   : > { %v801_v16 = vpop.f32.mrf.mxu2  ;;  %2126 = vmatmul.msk.f32.gmra.mxu0 %vm169_vm1, %v2492_v47 }
 0x13c   : > { %v813_v25 = vadd.f32 %v801_v16, %v755_v8  ;;  %v858_v43 = vpop.f32.mrf.mxu3 }
 0x13e   : > { %v870_v14 = vadd.f32 %v858_v43, %v813_v25 }
 0x13f   : > { %v954_v13 = vpop.f32.mrf.mxu1 }
 0x140   : > { %v3066_v4 = vadd.f32 %v915_v21, %v870_v14  ;;  %2078 = vmatmul.msk.f32.gmra.mxu2 %vm169_vm1, %v3062_v28  ;;  %v1130_v2 = vpop.f32.mrf.mxu0  ;;  %v978_v55 = vadd.f32 %v954_v13, %v2965_v46 }
 0x141   : > { %2087 = vmatmul.msk.f32.gmra.mxu3 %vm169_vm1, %v2998_v19 }
 0x142   : > { %2098 = vmatmul.msk.f32.vlgmr.msrb.gmra.mxu1 %vm169_vm1, %v2610_v40 }
 0x143   : > { %v804_v31 = vpop.f32.mrf.mxu2  ;;  %2127 = vmatmul.msk.f32.gmra.mxu0 %vm169_vm1, %v2474_v37 }
 0x144   : > { %v814_v36 = vadd.f32 %v804_v31, %v756_v17  ;;  %v861_v24 = vpop.f32.mrf.mxu3  ;;  %v1440_v17 = vrot.slane %v2998_v19, 3  ;;  %v1441_v31 = vrot.slane %v3000_v59, 3 }
 0x146   : > { %v871_v47 = vadd.f32 %v861_v24, %v814_v36 }
 0x147   : > { %v957_v21 = vpop.f32.mrf.mxu1 }
 0x148   : > { %v3077_v42 = vadd.f32 %v918_v29, %v871_v47  ;;  %2107 = vmatmul.msk.f32.vlgmr.msrb.gmra.mxu2 %vm169_vm1, %v2615_v41  ;;  %v1133_v40 = vpop.f32.mrf.mxu0  ;;  %v3118_v47 = vsel %vm516_vm6, %v1440_v17, %v1441_v31 }
 0x149   : > { %2116 = vmatmul.msk.f32.vlgmr.msrb.gmra.mxu3 %vm169_vm1, %v2561_v15  ;;  %v979_v15 = vadd.f32 %v957_v21, %v2976_v0  ;;  %v1497_v21 = vrot.slane %v2998_v19, 4 }
 0x14a   : > { %2099 = vmatmul.msk.f32.gmra.mxu1 %vm169_vm1, %v2633_v57 }
 0x14b   : > { %v1009_v34 = vpop.f32.mrf.mxu2  ;;  %2128 = vmatmul.msk.f32.gmra.mxu0 %vm169_vm1, %v2501_v50 }
 0x14c   : > { %v1033_v63 = vadd.f32 %v1009_v34, %v978_v55  ;;  %v1067_v33 = vpop.f32.mrf.mxu3 }
 0x14e   : > { %v1091_v37 = vadd.f32 %v1067_v33, %v1033_v63 }
 0x14f   : > { %v960_v29 = vpop.f32.mrf.mxu1 }
 0x150   : > { %v3088_v38 = vadd.f32 %v1124_v35, %v1091_v37  ;;  %2108 = vmatmul.msk.f32.gmra.mxu2 %vm169_vm1, %v2638_v58  ;;  %v1136_v41 = vpop.f32.mrf.mxu0  ;;  %v980_v0 = vadd.f32 %v960_v29, %v2987_v22 }
 0x151   : > { %2117 = vmatmul.msk.f32.gmra.mxu3 %vm169_vm1, %v2584_v27 }
 0x152   : > { %2100 = vmatmul.msk.f32.gmra.mxu1 %vm169_vm1, %v2668_v12 }
 0x153   : > { %v1012_v46 = vpop.f32.mrf.mxu2  ;;  %2129 = vmatmul.msk.f32.gmra.mxu0 %vm169_vm1, %v2757_v51  ;;  %v1383_v51 = vrot.slane %v2998_v19, 2 }
 0x154   : > { %v1034_v54 = vadd.f32 %v1012_v46, %v979_v15  ;;  %v1070_v8 = vpop.f32.mrf.mxu3 }
 0x156   : > { %v1092_v50 = vadd.f32 %v1070_v8, %v1034_v54  ;;  %v3145_v8 = vld [vmem:[#allocation2 + $0xb0] sm:$0xff] }
 0x157   : > { %v963_v35 = vpop.f32.mrf.mxu1 }
 0x158   : > { %v3099_v16 = vadd.f32 %v1127_v32, %v1092_v50  ;;  %2109 = vmatmul.msk.f32.gmra.mxu2 %vm169_vm1, %v2673_v6  ;;  %v1139_v25 = vpop.f32.mrf.mxu0  ;;  %v1384_v32 = vrot.slane %v3000_v59, 2  ;;  %v981_v63 = vadd.f32 %v963_v35, %v3004_v11 }
 0x159   : > { %2118 = vmatmul.msk.f32.gmra.mxu3 %vm169_vm1, %v2607_v39 }
 0x15a   : > { %2101 = vmatmul.msk.f32.gmra.mxu1 %vm169_vm1, %v2690_v23  ;;  %v3115_v24 = vsel %vm423_vm5, %v1383_v51, %v1384_v32 }
 0x15b   : > { %v1015_v43 = vpop.f32.mrf.mxu2  ;;  %2130 = vmatmul.msk.f32.gmra.mxu0 %vm169_vm1, %v2875_v20  ;;  %v1498_v20 = vrot.slane %v3000_v59, 4 }
 0x15c   : > { %v1035_v14 = vadd.f32 %v1015_v43, %v980_v0  ;;  %v1073_v13 = vpop.f32.mrf.mxu3 }
 0x15d   : > { %v3129_v34 = vsel %vm609_vm4, %v1497_v21, %v1498_v20 }
 0x15e   : > { %v1093_v36 = vadd.f32 %v1073_v13, %v1035_v14 }
 0x15f   : > { %v966_v22 = vpop.f32.mrf.mxu1 }
 0x160   : > { %v3122_v55 = vadd.f32 %v1130_v2, %v1093_v36  ;;  %2110 = vmatmul.msk.f32.gmra.mxu2 %vm169_vm1, %v2695_v18  ;;  %v1142_v33 = vpop.f32.mrf.mxu0  ;;  %v982_v11 = vadd.f32 %v966_v22, %v3030_v48 }
 0x161   : > { %2119 = vmatmul.msk.f32.gmra.mxu3 %vm169_vm1, %v2630_v56 }
 0x162   : > { %2102 = vmatmul.msk.f32.gmra.mxu1 %vm169_vm1, %v2708_v26 }
 0x163   : > { %v1018_v37 = vpop.f32.mrf.mxu2  ;;  %2131 = vmatmul.msk.f32.gmra.mxu0 %vm169_vm1, %v2998_v19 }
 0x164   : > { %v1036_v29 = vadd.f32 %v1018_v37, %v981_v63  ;;  %v1076_v59 = vpop.f32.mrf.mxu3 }
 0x166   : > { %v1094_v2 = vadd.f32 %v1076_v59, %v1036_v29 }
 0x167   : > { %v969_v15 = vpop.f32.mrf.mxu1 }
 0x168   : > { %v3136_v46 = vadd.f32 %v1133_v40, %v1094_v2  ;;  %2111 = vmatmul.msk.f32.gmra.mxu2 %vm169_vm1, %v2713_v30  ;;  %v1145_v54 = vpop.f32.mrf.mxu0  ;;  %v983_v48 = vadd.f32 %v969_v15, %v3050_v52 }
 0x169   : > { %2120 = vmatmul.msk.f32.gmra.mxu3 %vm169_vm1, %v2663_v9 }
 0x16a   : > { %2103 = vmatmul.msk.f32.gmra.mxu1 %vm169_vm1, %v2820_v5 }
 0x16b   : > { %v1021_v50 = vpop.f32.mrf.mxu2  ;;  %2132 = vmatmul.msk.f32.gmra.mxu0 %vm169_vm1, %v3145_v8 }
 0x16c   : > { %v1037_v19 = vadd.f32 %v1021_v50, %v982_v11  ;;  %v1079_v35 = vpop.f32.mrf.mxu3 }
 0x16e   : > { %v1095_v40 = vadd.f32 %v1079_v35, %v1037_v19 }
 0x16f   : > { %v972_v0 = vpop.f32.mrf.mxu1 }
 0x170   : > { %v3149_v43 = vadd.f32 %v1136_v41, %v1095_v40  ;;  %2112 = vmatmul.msk.f32.gmra.mxu2 %vm169_vm1, %v2777_v45  ;;  %v1351_v14 = vpop.f32.mrf.mxu0  ;;  %v984_v52 = vadd.f32 %v972_v0, %v3066_v4 }
 0x171   : > { %2121 = vmatmul.msk.f32.gmra.mxu3 %vm169_vm1, %v2925_v7 }
 0x172   : > { %2104 = vmatmul.msk.f32.gmra.mxu1 %vm169_vm1, %v2898_v53 }
 0x173   : > { %v1024_v13 = vpop.f32.mrf.mxu2  ;;  %2161 = vmatmul.msk.f32.vlgmr.msra.gmra.mxu0 %vm169_vm1, %v2584_v27 }
 0x174   : > { %v1038_v51 = vadd.f32 %v1024_v13, %v983_v48  ;;  %v1082_v32 = vpop.f32.mrf.mxu3 }
 0x176   : > { %v1096_v41 = vadd.f32 %v1082_v32, %v1038_v51 }
 0x177   : > { %v975_v17 = vpop.f32.mrf.mxu1 }
 0x178   : > { %v3160_v31 = vadd.f32 %v1139_v25, %v1096_v41  ;;  %2113 = vmatmul.msk.f32.gmra.mxu2 %vm169_vm1, %v3048_v10  ;;  %v1354_v36 = vpop.f32.mrf.mxu0  ;;  %v985_v4 = vadd.f32 %v975_v17, %v3077_v42  ;;  %v235_v41 = vld [vmem:[#allocation2 + $0xb8] sm:$0xf] }
 0x179   : > { %2122 = vmatmul.msk.f32.gmra.mxu3 %vm169_vm1, %v3062_v28 }
 0x17a   : > { %2105 = vmatmul.msk.f32.gmra.mxu1 %vm169_vm1, %v3115_v24 }
 0x17b   : > { %v1027_v22 = vpop.f32.mrf.mxu2  ;;  %2162 = vmatmul.msk.f32.gmra.mxu0 %vm169_vm1, %v2607_v39 }
 0x17c   : > { %v1039_v21 = vadd.f32 %v1027_v22, %v984_v52  ;;  %v1085_v20 = vpop.f32.mrf.mxu3  ;;  %v1782_v52 = vrot.slane %v235_v41, 4 }
 0x17e   : > { %v1097_v27 = vadd.f32 %v1085_v20, %v1039_v21 }
 0x17f   : > { %v1181_v25 = vpop.f32.mrf.mxu1 }
 0x180   : > { %v3171_v63 = vadd.f32 %v1142_v33, %v1097_v27  ;;  %2114 = vmatmul.msk.f32.gmra.mxu2 %vm169_vm1, %v3118_v47  ;;  %v1205_v37 = vadd.f32 %v1181_v25, %v3088_v38  ;;  %v1357_v29 = vpop.f32.mrf.mxu0 }
 0x181   : > { %2123 = vmatmul.msk.f32.gmra.mxu3 %vm169_vm1, %v3129_v34 }
 0x182   : > { %2134 = vmatmul.msk.f32.vlgmr.msra.gmra.mxu1 %vm169_vm1, %v2488_v44 }
 0x183   : > { %v1030_v59 = vpop.f32.mrf.mxu2  ;;  %2163 = vmatmul.msk.f32.gmra.mxu0 %vm169_vm1, %v2630_v56 }
 0x184   : > { %v1040_v39 = vadd.f32 %v1030_v59, %v985_v4  ;;  %v1088_v2 = vpop.f32.mrf.mxu3 }
 0x186   : > { %v1098_v33 = vadd.f32 %v1088_v2, %v1040_v39 }
 0x187   : > { %v1184_v15 = vpop.f32.mrf.mxu1 }
 0x188   : > { %v3183_v11 = vadd.f32 %v1145_v54, %v1098_v33  ;;  %2143 = vmatmul.msk.f32.vlgmr.msra.gmra.mxu2 %vm169_vm1, %v2633_v57  ;;  %v1206_v38 = vadd.f32 %v1184_v15, %v3099_v16  ;;  %v1360_v44 = vpop.f32.mrf.mxu0  ;;  %v1724_v33 = vrot.slane %v3145_v8, 3  ;;  %v1725_v15 = vrot.slane %v235_v41, 3 }
 0x189   : > { %2152 = vmatmul.msk.f32.vlgmr.msra.gmra.mxu3 %vm169_vm1, %v2638_v58 }
 0x18a   : > { %2135 = vmatmul.msk.f32.gmra.mxu1 %vm169_vm1, %v2524_v60 }
 0x18b   : > { %v1238_v42 = vpop.f32.mrf.mxu2  ;;  %2164 = vmatmul.msk.f32.gmra.mxu0 %vm169_vm1, %v2663_v9 }
 0x18c   : > { %v1262_v50 = vadd.f32 %v1238_v42, %v1205_v37  ;;  %v1293_v19 = vpop.f32.mrf.mxu3  ;;  %v1611_v37 = vrot.slane %v235_v41, 1 }
 0x18e   : > { %v1317_v56 = vadd.f32 %v1293_v19, %v1262_v50 }
 0x18f   : > { %v1187_v54 = vpop.f32.mrf.mxu1 }
 0x190   : > { %v3194_v35 = vadd.f32 %v1351_v14, %v1317_v56  ;;  %2144 = vmatmul.msk.f32.gmra.mxu2 %vm169_vm1, %v2668_v12  ;;  %v1207_v57 = vadd.f32 %v1187_v54, %v3122_v55  ;;  %v1363_v60 = vpop.f32.mrf.mxu0 }
 0x191   : > { %2153 = vmatmul.msk.f32.gmra.mxu3 %vm169_vm1, %v2673_v6 }
 0x192   : > { %2136 = vmatmul.msk.f32.gmra.mxu1 %vm169_vm1, %v2499_v49 }
 0x193   : > { %v1241_v58 = vpop.f32.mrf.mxu2  ;;  %2165 = vmatmul.msk.f32.gmra.mxu0 %vm169_vm1, %v2925_v7 }
 0x194   : > { %v1263_v16 = vadd.f32 %v1241_v58, %v1206_v38  ;;  %v1296_v40 = vpop.f32.mrf.mxu3 }
 0x196   : > { %v1318_v9 = vadd.f32 %v1296_v40, %v1263_v16 }
 0x197   : > { %v1190_v0 = vpop.f32.mrf.mxu1 }
 0x198   : > { %v3205_v48 = vadd.f32 %v1354_v36, %v1318_v9  ;;  %2145 = vmatmul.msk.f32.gmra.mxu2 %vm169_vm1, %v2690_v23  ;;  %v1208_v12 = vadd.f32 %v1190_v0, %v3136_v46  ;;  %v1366_v49 = vpop.f32.mrf.mxu0 }
 0x199   : > { %2154 = vmatmul.msk.f32.gmra.mxu3 %vm169_vm1, %v2695_v18 }
 0x19a   : > { %2137 = vmatmul.msk.f32.gmra.mxu1 %vm169_vm1, %v2529_v61 }
 0x19b   : > { %v1244_v6 = vpop.f32.mrf.mxu2  ;;  %2166 = vmatmul.msk.f32.gmra.mxu0 %vm169_vm1, %v3062_v28 }
 0x19c   : > { %v1264_v55 = vadd.f32 %v1244_v6, %v1207_v57  ;;  %v1299_v14 = vpop.f32.mrf.mxu3 }
 0x19e   : > { %v1319_v7 = vadd.f32 %v1299_v14, %v1264_v55 }
 0x19f   : > { %v1193_v13 = vpop.f32.mrf.mxu1 }
 0x1a0   : > { %v3216_v51 = vadd.f32 %v1357_v29, %v1319_v7  ;;  %2146 = vmatmul.msk.f32.gmra.mxu2 %vm169_vm1, %v2708_v26  ;;  %v1209_v23 = vadd.f32 %v1193_v13, %v3149_v43  ;;  %v1369_v61 = vpop.f32.mrf.mxu0  ;;  %v1781_v26 = vrot.slane %v3145_v8, 4 }
 0x1a1   : > { %2155 = vmatmul.msk.f32.gmra.mxu3 %vm169_vm1, %v2713_v30 }
 0x1a2   : > { %2138 = vmatmul.msk.f32.gmra.mxu1 %vm169_vm1, %v2815_v3 }
 0x1a3   : > { %v1247_v18 = vpop.f32.mrf.mxu2  ;;  %2167 = vmatmul.msk.f32.gmra.mxu0 %vm169_vm1, %v3129_v34  ;;  %v1783_v34 = vsel %vm609_vm4, %v1781_v26, %v1782_v52 }
 0x1a4   : > { %v1265_v46 = vadd.f32 %v1247_v18, %v1208_v12  ;;  %v1302_v32 = vpop.f32.mrf.mxu3 }
 0x1a6   : > { %v1320_v28 = vadd.f32 %v1302_v32, %v1265_v46 }
 0x1a7   : > { %v1196_v17 = vpop.f32.mrf.mxu1 }
 0x1a8   : > { %v3228_v43 = vadd.f32 %v1360_v44, %v1320_v28  ;;  %2147 = vmatmul.msk.f32.gmra.mxu2 %vm169_vm1, %v2820_v5  ;;  %v1210_v30 = vadd.f32 %v1196_v17, %v3160_v31  ;;  %v1372_v3 = vpop.f32.mrf.mxu0  ;;  %v1610_v31 = vrot.slane %v3145_v8, 1 }
 0x1a9   : > { %2156 = vmatmul.msk.f32.gmra.mxu3 %vm169_vm1, %v2777_v45 }
 0x1aa   : > { %2139 = vmatmul.msk.f32.gmra.mxu1 %vm169_vm1, %v2941_v1 }
 0x1ab   : > { %v1250_v36 = vpop.f32.mrf.mxu2  ;;  %2168 = vmatmul.msk.f32.gmra.mxu0 %vm169_vm1, %v1783_v34 }
 0x1ac   : > { %v1266_v22 = vadd.f32 %v1250_v36, %v1209_v23  ;;  %v1305_v21 = vpop.f32.mrf.mxu3 }
 0x1ae   : > { %v1321_v20 = vadd.f32 %v1305_v21, %v1266_v22 }
 0x1af   : > { %v1199_v27 = vpop.f32.mrf.mxu1 }
 0x1b0   : > { %v3239_v25 = vadd.f32 %v1363_v60, %v1321_v20  ;;  %2148 = vmatmul.msk.f32.gmra.mxu2 %vm169_vm1, %v2898_v53  ;;  %v1211_v45 = vadd.f32 %v1199_v27, %v3171_v63  ;;  %v3248_v5 = vpop.f32.mrf.mxu0  ;;  %v1612_v53 = vsel %vm277_vm3, %v1610_v31, %v1611_v37  ;;  %v1668_v63 = vrot.slane %v235_v41, 2 }
 0x1b1   : > { %2157 = vmatmul.msk.f32.gmra.mxu3 %vm169_vm1, %v3048_v10 }
 0x1b2   : > { %2140 = vmatmul.msk.f32.gmra.mxu1 %vm169_vm1, %v3021_v62  ;;  %v1667_v62 = vrot.slane %v3145_v8, 2 }
 0x1b3   : > { %v1253_v1 = vpop.f32.mrf.mxu2 }
 0x1b4   : > { %v1267_v4 = vadd.f32 %v1253_v1, %v1210_v30  ;;  %v1308_v29 = vpop.f32.mrf.mxu3 }
 0x1b6   : > { %v1322_v59 = vadd.f32 %v1308_v29, %v1267_v4 }
 0x1b7   : > { %v1202_v39 = vpop.f32.mrf.mxu1 }
 0x1b8   : > { %v3252_v2 = vadd.f32 %v1366_v49, %v1322_v59  ;;  %2149 = vmatmul.msk.f32.gmra.mxu2 %vm169_vm1, %v3115_v24  ;;  %v1212_v10 = vadd.f32 %v1202_v39, %v3183_v11  ;;  %v3262_v38 = vpop.f32.mrf.mxu0  ;;  %v1669_v24 = vsel %vm423_vm5, %v1667_v62, %v1668_v63  ;;  %v1726_v11 = vsel %vm516_vm6, %v1724_v33, %v1725_v15 }
 0x1b9   : > { %2158 = vmatmul.msk.f32.gmra.mxu3 %vm169_vm1, %v3118_v47 }
 0x1ba   : > { %2141 = vmatmul.msk.f32.gmra.mxu1 %vm169_vm1, %v1612_v53 }
 0x1bb   : > { %v1256_v44 = vpop.f32.mrf.mxu2 }
 0x1bc   : > { %v1268_v42 = vadd.f32 %v1256_v44, %v1211_v45  ;;  %v1311_v50 = vpop.f32.mrf.mxu3 }
 0x1be   : > { %v1323_v19 = vadd.f32 %v1311_v50, %v1268_v42 }
 0x1bf   : > { %v1408_v56 = vpop.f32.mrf.mxu1 }
 0x1c0   : > { %v3266_v47 = vadd.f32 %v1369_v61, %v1323_v19  ;;  %2150 = vmatmul.msk.f32.gmra.mxu2 %vm169_vm1, %v1669_v24  ;;  %v3270_v8 = vpop.f32.mrf.mxu0  ;;  %v1432_v20 = vadd.f32 %v1408_v56, %v3194_v35 }
 0x1c1   : > { %2159 = vmatmul.msk.f32.gmra.mxu3 %vm169_vm1, %v1726_v11 }
 0x1c3   : > { %v1259_v54 = vpop.f32.mrf.mxu2 }
 0x1c4   : > { %v1269_v57 = vadd.f32 %v1259_v54, %v1212_v10  ;;  %v1314_v60 = vpop.f32.mrf.mxu3 }
 0x1c6   : > { %v1324_v58 = vadd.f32 %v1314_v60, %v1269_v57 }
 0x1c7   : > { %v1411_v16 = vpop.f32.mrf.mxu1 }
 0x1c8   : > { %v3272_v40 = vadd.f32 %v1372_v3, %v1324_v58  ;;  %v3274_v12 = vpop.f32.mrf.mxu0  ;;  %v1433_v29 = vadd.f32 %v1411_v16, %v3205_v48  ;;  %v3318_v48 = vld [vmem:[%s3406_s2] ss:$0 sm:$0xff] }
 0x1cb   : > { %v1465_v9 = vpop.f32.mrf.mxu2 }
 0x1cc   : > { %v1522_v0 = vpop.f32.mrf.mxu3  ;;  %v1489_v1 = vadd.f32 %v1465_v9, %v1432_v20 }
 0x1ce   : > { %v1546_v37 = vadd.f32 %v1522_v0, %v1489_v1 }
 0x1cf   : > { %v1414_v49 = vpop.f32.mrf.mxu1 }
 0x1d0   : > { %v3276_v7 = vpop.f32.mrf.mxu0  ;;  %v1601_v39 = vadd.f32 %v3248_v5, %v1546_v37  ;;  %v1434_v44 = vadd.f32 %v1414_v49, %v3216_v51 }
 0x1d3   : > { %v1468_v6 = vpop.f32.mrf.mxu2 }
 0x1d4   : > { %v1525_v55 = vpop.f32.mrf.mxu3  ;;  %v1490_v53 = vadd.f32 %v1468_v6, %v1433_v29 }
 0x1d6   : > { %v1547_v35 = vadd.f32 %v1525_v55, %v1490_v53 }
 0x1d7   : > { %v1417_v14 = vpop.f32.mrf.mxu1 }
 0x1d8   : > { %v3280_v18 = vpop.f32.mrf.mxu0  ;;  %v1602_v5 = vadd.f32 %v3262_v38, %v1547_v35  ;;  %v1435_v16 = vadd.f32 %v1417_v14, %v3228_v43 }
 0x1db   : > { %v1471_v13 = vpop.f32.mrf.mxu2 }
 0x1dc   : > { %v1528_v23 = vpop.f32.mrf.mxu3  ;;  %v1491_v24 = vadd.f32 %v1471_v13, %v1434_v44 }
 0x1de   : > { %v1548_v51 = vadd.f32 %v1528_v23, %v1491_v24 }
 0x1df   : > { %v3278_v61 = vpop.f32.mrf.mxu1 }
 0x1e0   : > { %v3286_v17 = vpop.f32.mrf.mxu0  ;;  %v1603_v0 = vadd.f32 %v3270_v8, %v1548_v51  ;;  %v1436_v43 = vadd.f32 %v3278_v61, %v3239_v25 }
 0x1e3   : > { %v1474_v46 = vpop.f32.mrf.mxu2 }
 0x1e4   : > { %v1531_v32 = vpop.f32.mrf.mxu3  ;;  %v1492_v49 = vadd.f32 %v1474_v46, %v1435_v16 }
 0x1e6   : > { %v1549_v20 = vadd.f32 %v1531_v32, %v1492_v49 }
 0x1e7   : > { %v3282_v28 = vpop.f32.mrf.mxu1 }
 0x1e8   : > { %v3296_v34 = vpop.f32.mrf.mxu0  ;;  %v1604_v37 = vadd.f32 %v3274_v12, %v1549_v20  ;;  %v1437_v25 = vadd.f32 %v3282_v28, %v3252_v2 }
 0x1eb   : > { %v3284_v41 = vpop.f32.mrf.mxu2 }
 0x1ec   : > { %v3288_v26 = vpop.f32.mrf.mxu3  ;;  %v1493_v8 = vadd.f32 %v3284_v41, %v1436_v43 }
 0x1ee   : > { %v1550_v32 = vadd.f32 %v3288_v26, %v1493_v8 }
 0x1ef   : > { %v3290_v52 = vpop.f32.mrf.mxu1 }
 0x1f0   : > { %v1806_v45 = vpop.f32.mrf.mxu0  ;;  %v1605_v41 = vadd.f32 %v3276_v7, %v1550_v32  ;;  %v1438_v2 = vadd.f32 %v3290_v52, %v3266_v47 }
 0x1f3   : > { %v3292_v30 = vpop.f32.mrf.mxu2 }
 0x1f4   : > { %v3294_v3 = vpop.f32.mrf.mxu3 }
 0x1f7   : > { %v3298_v36 = vpop.f32.mrf.mxu1 }
 0x1f8   : > { %v1809_v10 = vpop.f32.mrf.mxu0  ;;  %v1439_v47 = vadd.f32 %v3298_v36, %v3272_v40 }
 0x1fb   : > { %v3300_v22 = vpop.f32.mrf.mxu2 }
 0x1fc   : > { %v3302_v21 = vpop.f32.mrf.mxu3 }
 0x1ff   : > { %v1635_v27 = vpop.f32.mrf.mxu1 }
 0x200   : > { %v1659_v62 = vadd.f32 %v1635_v27, %v1601_v39  ;;  %v1812_v57 = vpop.f32.mrf.mxu0 }
 0x203   : > { %v3305_v31 = vpop.f32.mrf.mxu2 }
 0x204   : > { %v3307_v4 = vpop.f32.mrf.mxu3 }
 0x207   : > { %v1638_v59 = vpop.f32.mrf.mxu1 }
 0x208   : > { %v1660_v11 = vadd.f32 %v1638_v59, %v1602_v5  ;;  %v1815_v1 = vpop.f32.mrf.mxu0 }
 0x20b   : > { %v1692_v63 = vpop.f32.mrf.mxu2 }
 0x20c   : > { %v1716_v33 = vadd.f32 %v1692_v63, %v1659_v62  ;;  %v1749_v15 = vpop.f32.mrf.mxu3  ;;  %v1494_v63 = vadd.f32 %v3292_v30, %v1437_v25  ;;  %v1495_v30 = vadd.f32 %v3300_v22, %v1438_v2  ;;  %v1496_v22 = vadd.f32 %v3305_v31, %v1439_v47 }
 0x20e   : > { %v1773_v42 = vadd.f32 %v1749_v15, %v1716_v33 }
 0x20f   : > { %v1641_v50 = vpop.f32.mrf.mxu1 }
 0x210   : > { %v1830_v19 = vadd.f32 %v1806_v45, %v1773_v42  ;;  %v1661_v55 = vadd.f32 %v1641_v50, %v1603_v0  ;;  %v1818_v12 = vpop.f32.mrf.mxu0  ;;  %v1551_v42 = vadd.f32 %v3294_v3, %v1494_v63  ;;  %v1552_v3 = vadd.f32 %v3302_v21, %v1495_v30 }
 0x211   : > { %v1553_v0 = vadd.f32 %v3307_v4, %v1496_v22 }
 0x212   : > { %v1842_v56 = vadd.f32 %v3318_v48, %v1830_v19  ;;  %v1606_v7 = vadd.f32 %v3280_v18, %v1551_v42  ;;  %v1607_v52 = vadd.f32 %v3286_v17, %v1552_v3 }
 0x213   : > { %v1695_v54 = vpop.f32.mrf.mxu2  ;;  %v1608_v17 = vadd.f32 %v3296_v34, %v1553_v0 }
 0x214   : > { %1851 = vst.msk [vmem:[%s3322_s29] sm:$0xff] %vm1850_vm7, %v1842_v56  ;;  %v1717_v60 = vadd.f32 %v1695_v54, %v1660_v11  ;;  %v1752_v58 = vpop.f32.mrf.mxu3 }
 0x216   : > { %v1774_v38 = vadd.f32 %v1752_v58, %v1717_v60 }
 0x217   : > { %v1644_v9 = vpop.f32.mrf.mxu1 }
 0x218   : > { %v1831_v6 = vadd.f32 %v1809_v10, %v1774_v38  ;;  %v1662_v59 = vadd.f32 %v1644_v9, %v1604_v37  ;;  %v1821_v19 = vpop.f32.mrf.mxu0 }
 0x21a   : > { %v1843_v13 = vadd.f32 %v3318_v48, %v1831_v6 }
 0x21b   : > { %v1698_v23 = vpop.f32.mrf.mxu2 }
 0x21c   : > { %1852 = vst.msk [vmem:[%s3322_s29 + $0x8] sm:$0xff] %vm1850_vm7, %v1843_v13  ;;  %v1718_v27 = vadd.f32 %v1698_v23, %v1661_v55  ;;  %v1755_v45 = vpop.f32.mrf.mxu3 }
 0x21e   : > { %v1775_v14 = vadd.f32 %v1755_v45, %v1718_v27 }
 0x21f   : > { %v1647_v29 = vpop.f32.mrf.mxu1 }
 0x220   : > { %v1832_v46 = vadd.f32 %v1812_v57, %v1775_v14  ;;  %v1663_v33 = vadd.f32 %v1647_v29, %v1605_v41  ;;  %v1824_v9 = vpop.f32.mrf.mxu0 }
 0x222   : > { %v1844_v39 = vadd.f32 %v3318_v48, %v1832_v46 }
 0x223   : > { %v1701_v53 = vpop.f32.mrf.mxu2 }
 0x224   : > { %1853 = vst.msk [vmem:[%s3322_s29 + $0x10] sm:$0xff] %vm1850_vm7, %v1844_v39  ;;  %v1719_v10 = vadd.f32 %v1701_v53, %v1662_v59  ;;  %v1758_v62 = vpop.f32.mrf.mxu3 }
 0x226   : > { %v1776_v61 = vadd.f32 %v1758_v62, %v1719_v10 }
 0x227   : > { %v1650_v26 = vpop.f32.mrf.mxu1 }
 0x228   : > { %v1833_v35 = vadd.f32 %v1815_v1, %v1776_v61  ;;  %v1664_v11 = vadd.f32 %v1650_v26, %v1606_v7  ;;  %v1827_v27 = vpop.f32.mrf.mxu0 }
 0x22a   : > { %v1845_v15 = vadd.f32 %v3318_v48, %v1833_v35 }
 0x22b   : > { %v1704_v44 = vpop.f32.mrf.mxu2 }
 0x22c   : > { %1854 = vst.msk [vmem:[%s3322_s29 + $0x18] sm:$0xff] %vm1850_vm7, %v1845_v15  ;;  %v1720_v50 = vadd.f32 %v1704_v44, %v1663_v33  ;;  %v1761_v5 = vpop.f32.mrf.mxu3 }
 0x22e   : > { %v1777_v28 = vadd.f32 %v1761_v5, %v1720_v50 }
 0x22f   : > { %v1653_v60 = vpop.f32.mrf.mxu1 }
 0x230   : > { %v1834_v24 = vadd.f32 %v1818_v12, %v1777_v28  ;;  %v1665_v16 = vadd.f32 %v1653_v60, %v1607_v52 }
 0x232   : > { %v1846_v56 = vadd.f32 %v3318_v48, %v1834_v24 }
 0x233   : > { %v1707_v54 = vpop.f32.mrf.mxu2 }
 0x234   : > { %1855 = vst.msk [vmem:[%s3322_s29 + $0x20] sm:$0xff] %vm1850_vm7, %v1846_v56  ;;  %v1721_v57 = vadd.f32 %v1707_v54, %v1664_v11  ;;  %v1764_v51 = vpop.f32.mrf.mxu3 }
 0x236   : > { %v1778_v18 = vadd.f32 %v1764_v51, %v1721_v57 }
 0x237   : > { %v1656_v6 = vpop.f32.mrf.mxu1 }
 0x238   : > { %v1835_v58 = vadd.f32 %v1821_v19, %v1778_v18  ;;  %v1666_v31 = vadd.f32 %v1656_v6, %v1608_v17 }
 0x23a   : > { %v1847_v38 = vadd.f32 %v3318_v48, %v1835_v58 }
 0x23b   : > { %v1710_v21 = vpop.f32.mrf.mxu2 }
 0x23c   : > { %1856 = vst.msk [vmem:[%s3322_s29 + $0x28] sm:$0xff] %vm1850_vm7, %v1847_v38  ;;  %v1722_v49 = vadd.f32 %v1710_v21, %v1665_v16  ;;  %v1767_v40 = vpop.f32.mrf.mxu3 }
 0x23e   : > { %v1779_v36 = vadd.f32 %v1767_v40, %v1722_v49 }
 0x240   : > { %v1836_v55 = vadd.f32 %v1824_v9, %v1779_v36 }
 0x242   : > { %v1848_v13 = vadd.f32 %v3318_v48, %v1836_v55 }
 0x243   : > { %v1713_v23 = vpop.f32.mrf.mxu2 }
 0x244   : > { %1857 = vst.msk [vmem:[%s3322_s29 + $0x30] sm:$0xff] %vm1850_vm7, %v1848_v13  ;;  %v1723_v4 = vadd.f32 %v1713_v23, %v1666_v31  ;;  %v1770_v20 = vpop.f32.mrf.mxu3 }
 0x246   : > { %v1780_v45 = vadd.f32 %v1770_v20, %v1723_v4 }
 0x248   : > { %v1837_v34 = vadd.f32 %v1827_v27, %v1780_v45 }
 0x24a   : > { %v1849_v1 = vadd.f32 %v3318_v48, %v1837_v34 }
 0x24c   : > { %1858 = vst.msk [vmem:[%s3322_s29 + $0x38] sm:$0xff] %vm1850_vm7, %v1849_v1 }
 0x24d   : > { %2249 = shalt.err (!%p2246_p3)
}
 0x24e   : > { %s2287_s26 = smov 128   ;;  %s2288_s27 = smov 8  }
 0x24f   : > { %2179 = dma.vmem_to_hbm [thread:$0]  (%p2347_p5), %s1873_s8, 1024, %s1875_s9, %s1860_s16, %s2287_s26, %s2287_s26, %s2288_s27  }
 0x250 PF: > { %p2185_p4 = scmp.ge.s32.totalorder %s2284_s15, 2  ;;  %s1889_s30 = sand.u32 1, %s2272_s12  }
 0x251   : > { %s1890_s28 = scalar_lea.sflag [#allocation4], %s1889_s30 }
 0x252   : > { %p2182_p7 = pnand %p2185_p4, %p2351_p6 }
 0x254   : > { %p2183_p8 = pneg %p2182_p7 }
 0x256   : > { %2267 = dma.done.wait (%p2183_p8), %s1890_s28, 1024  }
 0x257   : > { %2269 = vsyncadd (%p2183_p8), %s1890_s28, 4294966272  ;;  %p13_p9 = scmp.ge.s32.totalorder %s2334_s18, 4   ;;  %s3410_s12 = smov %s2276_s13 }
 0x258   : > { %s3411_s13 = smov %s2280_s14  ;;  %s3412_s14 = smov %s2345_s21 }
 0x259   : > { %s3413_s15 = smov %s2334_s18  ;;  %15 = sbr.rel (!%p13_p9) target bundleno = 3 (0x3), region = 68 }
 0x25e   :  { %1896 = vsyncpa [#allocation4], 1 }
 0x25f   :  { %1898 = vsyncpa [#allocation4 + $0x1], 1 }

</bundles_post_ra>
